<compile_context>
chip_gen: v7x
topology: tpu7x:2x2x1
jax: 0.10.0
libtpu: 0.0.40
codegen_flags: <defaults>
</compile_context>

<pallas_src>
import functools

import jax
import jax.numpy as jnp
from jax import lax
from jax.experimental import pallas as pl
from jax.experimental.pallas import tpu as pltpu

EPS = 1e-5


# ----------------------------------------------------------------------------
# Tile selection helpers
# ----------------------------------------------------------------------------
def _pick_tile(dim, target, quanta):
    """Largest multiple of a quantum that divides `dim` and is <= target.

    Falls back to the full dim (block == array dim satisfies the (8,128)
    rule) if no divisor is found.
    """
    if dim <= target:
        return dim
    for q in quanta:
        t = (target // q) * q
        while t >= q:
            if dim % t == 0:
                return t
            t -= q
    return dim


def _vmem_limit(est_bytes):
    # Explicit scoped-VMEM budget with headroom; stays below v7x's 64 MiB.
    return int(min(60 * 2**20, max(32 * 2**20, 2 * est_bytes)))


# ----------------------------------------------------------------------------
# Kernel 1/3: fused (X @ W) -> BN epilogue, optionally fused with the shortcut
# branch (projection matmul + BN, or identity residual), + ReLU.
# Grid = (M tiles, N tiles, K tiles); f32 accumulator in VMEM scratch.
# ----------------------------------------------------------------------------
def _fused_matmul_kernel(*refs, relu, mode):
    if mode == "proj":
        (x_ref, w_ref, s_ref, b_ref,
         xs_ref, ws_ref, ss_ref, bs_ref, o_ref, acc_ref) = refs
    elif mode == "identity":
        x_ref, w_ref, s_ref, b_ref, res_ref, o_ref, acc_ref = refs
    else:
        x_ref, w_ref, s_ref, b_ref, o_ref, acc_ref = refs

    k = pl.program_id(2)

    @pl.when(k == 0)
    def _():
        acc_ref[...] = jnp.zeros_like(acc_ref)

    acc_ref[...] += jnp.dot(x_ref[...], w_ref[...],
                            preferred_element_type=jnp.float32)

    @pl.when(k == pl.num_programs(2) - 1)
    def _():
        out = acc_ref[...] * s_ref[...] + b_ref[...]
        if mode == "proj":
            sc = jnp.dot(xs_ref[...], ws_ref[...],
                         preferred_element_type=jnp.float32)
            out = out + (sc * ss_ref[...] + bs_ref[...])
        elif mode == "identity":
            out = out + res_ref[...].astype(jnp.float32)
        if relu:
            out = jnp.maximum(out, 0.0)
        o_ref[...] = out.astype(o_ref.dtype)


def fused_conv1x1(x, w, scale, bias, *, relu, out_dtype, shortcut=None,
                  tm_target=512, tn_target=256, tk_target=512):
    """x: (M, K) bf16, w: (K, N) bf16, scale/bias: (1, N) f32.

    shortcut is None, ("identity", sc[M, N]) or
    ("proj", xs[M, Ks], ws[Ks, N], ss[1, N], bs[1, N]).
    """
    M, K = x.shape
    Kw, N = w.shape
    assert K == Kw

    tm = _pick_tile(M, tm_target, (128, 8))
    tn = _pick_tile(N, tn_target, (128,))
    tk = _pick_tile(K, tk_target, (128,))
    grid = (M // tm, N // tn, K // tk)

    in_specs = [
        pl.BlockSpec((tm, tk), lambda i, j, k: (i, k)),
        pl.BlockSpec((tk, tn), lambda i, j, k: (k, j)),
        pl.BlockSpec((1, tn), lambda i, j, k: (0, j)),
        pl.BlockSpec((1, tn), lambda i, j, k: (0, j)),
    ]
    args = [x, w, scale, bias]
    mode = "none"
    est = 2 * (tm * tk * 2 + tk * tn * 2 + 2 * tn * 4 + tm * tn * 4)
    if shortcut is not None:
        mode = shortcut[0]
        if mode == "proj":
            _, xs, ws, ss, bs = shortcut
            ks = xs.shape[1]
            in_specs += [
                pl.BlockSpec((tm, ks), lambda i, j, k: (i, 0)),
                pl.BlockSpec((ks, tn), lambda i, j, k: (0, j)),
                pl.BlockSpec((1, tn), lambda i, j, k: (0, j)),
                pl.BlockSpec((1, tn), lambda i, j, k: (0, j)),
            ]
            args += [xs, ws, ss, bs]
            est += 2 * (tm * ks * 2 + ks * tn * 2 + 2 * tn * 4)
        else:  # identity residual
            _, sc = shortcut
            in_specs.append(pl.BlockSpec((tm, tn), lambda i, j, k: (i, j)))
            args.append(sc)
            est += 2 * tm * tn * 2
    est += tm * tn * 4  # accumulator scratch

    kernel = functools.partial(_fused_matmul_kernel, relu=relu, mode=mode)
    return pl.pallas_call(
        kernel,
        out_shape=jax.ShapeDtypeStruct((M, N), out_dtype),
        grid_spec=pltpu.PrefetchScalarGridSpec(
            num_scalar_prefetch=0,
            grid=grid,
            in_specs=in_specs,
            out_specs=pl.BlockSpec((tm, tn), lambda i, j, k: (i, j)),
            scratch_shapes=[pltpu.VMEM((tm, tn), jnp.float32)],
        ),
        compiler_params=pltpu.CompilerParams(
            dimension_semantics=("parallel", "parallel", "arbitrary"),
            vmem_limit_bytes=_vmem_limit(est),
        ),
    )(*args)


# ----------------------------------------------------------------------------
# Kernel 2: 3x3 conv (stride s, pad 1) + BN + ReLU, im2col-free.
# One grid step per image: accumulate 9 shifted-tap matmuls in-kernel.
# ----------------------------------------------------------------------------
def _conv3x3_kernel(x_ref, w_ref, s_ref, b_ref, o_ref, *, stride, ho, wo):
    # x_ref: (1, hp, wp, c_in) zero-padded image; w_ref: (9, c_in, c_out)
    c_in = w_ref.shape[1]
    c_out = w_ref.shape[2]
    span_h = (ho - 1) * stride + 1
    span_w = (wo - 1) * stride + 1

    acc = jnp.zeros((ho * wo, c_out), jnp.float32)
    for dh in range(3):
        for dw in range(3):
            patch = x_ref[0, dh:dh + span_h, dw:dw + span_w, :]
            if stride > 1:
                patch = patch[::stride, ::stride, :]
            patch = patch.reshape(ho * wo, c_in)
            acc = acc + jnp.dot(patch, w_ref[dh * 3 + dw],
                                preferred_element_type=jnp.float32)

    out = jnp.maximum(acc * s_ref[...] + b_ref[...], 0.0)
    o_ref[...] = out.reshape(1, ho, wo, c_out).astype(o_ref.dtype)


def conv3x3_bn_relu(x, w9, scale, bias, stride):
    """x: (N, H, W, C) bf16; w9: (9, C, C_out) bf16 in (dh*3+dw) tap order."""
    n, h, w, c = x.shape
    c_out = w9.shape[2]
    ho = (h - 1) // stride + 1
    wo = (w - 1) // stride + 1
    xp = jnp.pad(x, ((0, 0), (1, 1), (1, 1), (0, 0)))
    hp, wp = h + 2, w + 2

    # TODO(synk): for large feature maps, tile H with halo rows instead of
    # loading the full padded image per grid step.
    est = 2 * (hp * wp * c * 2 + 9 * c * c_out * 2 + ho * wo * c_out * 2)
    kernel = functools.partial(_conv3x3_kernel, stride=stride, ho=ho, wo=wo)
    return pl.pallas_call(
        kernel,
        out_shape=jax.ShapeDtypeStruct((n, ho, wo, c_out), jnp.bfloat16),
        grid_spec=pltpu.PrefetchScalarGridSpec(
            num_scalar_prefetch=0,
            grid=(n,),
            in_specs=[
                pl.BlockSpec((1, hp, wp, c), lambda b: (b, 0, 0, 0)),
                pl.BlockSpec((9, c, c_out), lambda b: (0, 0, 0)),
                pl.BlockSpec((1, c_out), lambda b: (0, 0)),
                pl.BlockSpec((1, c_out), lambda b: (0, 0)),
            ],
            out_specs=pl.BlockSpec((1, ho, wo, c_out), lambda b: (b, 0, 0, 0)),
        ),
        compiler_params=pltpu.CompilerParams(
            dimension_semantics=("parallel",),
            vmem_limit_bytes=_vmem_limit(est),
        ),
    )(xp, w9, scale, bias)


# ----------------------------------------------------------------------------
# BottleNeck forward
# ----------------------------------------------------------------------------
def bottleneck_forward(x_nchw, params, stride, has_projection):
    x = jnp.transpose(x_nchw, (0, 2, 3, 1)).astype(jnp.bfloat16)  # NHWC bf16
    n, h, w, cin = x.shape
    cmid = params["w1"].shape[1]
    cexp = params["w3"].shape[1]

    # stage 1: 1x1 conv -> BN -> ReLU
    h1 = fused_conv1x1(x.reshape(n * h * w, cin),
                       params["w1"], params["s1"], params["b1"],
                       relu=True, out_dtype=jnp.bfloat16)
    h1 = h1.reshape(n, h, w, cmid)

    # stage 2: 3x3 conv (stride, pad=1) -> BN -> ReLU (no HBM im2col)
    h2 = conv3x3_bn_relu(h1, params["w2"], params["s2"], params["b2"], stride)
    ho, wo = h2.shape[1], h2.shape[2]
    h2_2d = h2.reshape(n * ho * wo, cmid)

    # stage 3: 1x1 conv -> BN, fused with shortcut branch + add + final ReLU
    if has_projection:
        # TODO(synk): for stride > 1 the strided spatial gather of the shortcut
        # input still happens in XLA; fold it into the kernel DMA if it matters.
        xs = x[:, ::stride, ::stride, :].reshape(n * ho * wo, cin)
        out2d = fused_conv1x1(
            h2_2d, params["w3"], params["s3"], params["b3"],
            relu=True, out_dtype=jnp.float32,
            shortcut=("proj", xs, params["ws"], params["ss"], params["bs"]))
    else:
        assert cin == cexp and stride == 1, "identity shortcut needs cin==cexp"
        sc = x.reshape(n * h * w, cin)
        out2d = fused_conv1x1(
            h2_2d, params["w3"], params["s3"], params["b3"],
            relu=True, out_dtype=jnp.float32, shortcut=("identity", sc))

    out = out2d.reshape(n, ho, wo, cexp)
    return jnp.transpose(out, (0, 3, 1, 2))  # back to NCHW


# ----------------------------------------------------------------------------
# Deterministic parameter init (shapes follow BottleNeck.__init__)
# ----------------------------------------------------------------------------
def fold_bn(gamma, beta, mean, var):
    scale = gamma / jnp.sqrt(var + EPS)
    bias = beta - mean * scale
    return scale[None, :].astype(jnp.float32), bias[None, :].astype(jnp.float32)


def init_params(key, in_channels, out_channels, expansion=4):
    c_exp = out_channels * expansion
    keys = jax.random.split(key, 8)

    def bn_params(k, c):
        k1, k2, k3, k4 = jax.random.split(k, 4)
        gamma = jax.random.uniform(k1, (c,), minval=0.5, maxval=1.5)
        beta = jax.random.normal(k2, (c,)) * 0.1
        mean = jax.random.normal(k3, (c,)) * 0.1
        var = jax.random.uniform(k4, (c,), minval=0.5, maxval=1.5)
        return fold_bn(gamma, beta, mean, var)

    p = {}
    # conv1: 1x1, in_channels -> out_channels
    p["w1"] = (jax.random.normal(keys[0], (in_channels, out_channels))
               * 0.1).astype(jnp.bfloat16)
    p["s1"], p["b1"] = bn_params(keys[1], out_channels)
    # conv2: 3x3, out_channels -> out_channels, taps stored (9, Cin, Cout)
    w2 = (jax.random.normal(keys[2], (3, 3, out_channels, out_channels))
          * 0.1).astype(jnp.bfloat16)
    p["w2"] = w2.reshape(9, out_channels, out_channels)
    p["w2_hwio"] = w2
    p["s2"], p["b2"] = bn_params(keys[3], out_channels)
    # conv3: 1x1, out_channels -> out_channels * 4
    p["w3"] = (jax.random.normal(keys[4], (out_channels, c_exp))
               * 0.1).astype(jnp.bfloat16)
    p["s3"], p["b3"] = bn_params(keys[5], c_exp)
    # shortcut projection: 1x1, in_channels -> out_channels * 4
    p["ws"] = (jax.random.normal(keys[6], (in_channels, c_exp))
               * 0.1).astype(jnp.bfloat16)
    p["ss"], p["bs"] = bn_params(keys[7], c_exp)
    return p


# ----------------------------------------------------------------------------
# Pure-JAX reference (lax convs, same bf16 activation/weight dtypes)
# ----------------------------------------------------------------------------
def reference_forward(x_nchw, params, stride, has_projection):
    x = jnp.transpose(x_nchw, (0, 2, 3, 1)).astype(jnp.bfloat16)
    dn = ("NHWC", "HWIO", "NHWC")

    def conv(inp, w_hwio, s, pad):
        return lax.conv_general_dilated(
            inp, w_hwio, (s, s), pad, dimension_numbers=dn,
            preferred_element_type=jnp.float32)

    h1 = jnp.maximum(conv(x, params["w1"][None, None], 1, [(0, 0), (0, 0)])
                     * params["s1"] + params["b1"], 0.0).astype(jnp.bfloat16)
    h2 = jnp.maximum(conv(h1, params["w2_hwio"], stride, [(1, 1), (1, 1)])
                     * params["s2"] + params["b2"], 0.0).astype(jnp.bfloat16)
    h3 = (conv(h2, params["w3"][None, None], 1, [(0, 0), (0, 0)])
          * params["s3"] + params["b3"])
    if has_projection:
        sc = (conv(x, params["ws"][None, None], stride, [(0, 0), (0, 0)])
              * params["ss"] + params["bs"])
    else:
        sc = x[:, ::stride, ::stride, :].astype(jnp.float32)
    out = jnp.maximum(h3 + sc, 0.0)
    return jnp.transpose(out, (0, 3, 1, 2))


# ----------------------------------------------------------------------------
if __name__ == "__main__":
    in_channels, out_channels, stride = 4, 4, 1
    expansion = 4
    has_projection = (stride != 1) or (in_channels != out_channels * expansion)

    key = jax.random.PRNGKey(0)
    k_x, k_p = jax.random.split(key)
    x = jax.random.normal(k_x, (2, in_channels, 16, 16), dtype=jnp.float32)
    params = init_params(k_p, in_channels, out_channels, expansion)

    out = jax.block_until_ready(
        bottleneck_forward(x, params, stride, has_projection))
    ref = jax.block_until_ready(
        reference_forward(x, params, stride, has_projection))

    assert out.shape == (2, out_channels * expansion, 16, 16), out.shape
    max_err = float(jnp.max(jnp.abs(out - ref)))
    assert max_err < 2e-2, max_err
    print("KERNEL_OK")
</pallas_src>

<mosaic_0001>
module attributes {stable_mosaic.version = 11 : i64} {
  func.func @_fused_matmul_kernel(%arg0: i32, %arg1: i32, %arg2: i32, %arg3: memref<512x4xbf16, #tpu.memory_space<vmem>>, %arg4: memref<4x4xbf16, #tpu.memory_space<vmem>>, %arg5: memref<1x4xf32, #tpu.memory_space<vmem>>, %arg6: memref<1x4xf32, #tpu.memory_space<vmem>>, %arg7: memref<512x4xbf16, #tpu.memory_space<vmem>>, %arg8: memref<512x4xf32, #tpu.memory_space<vmem>>) attributes {dimension_semantics = [#tpu.dimension_semantics<parallel>, #tpu.dimension_semantics<parallel>, #tpu.dimension_semantics<arbitrary>], iteration_bounds = array<i64: 1, 1, 1>, scalar_prefetch = 0 : i64, scratch_operands = 1 : i64, tpu.core_type = #tpu.core_type<tc>, window_params = [{transform_indices = @transform_0, window_bounds = array<i64: 512, 4>}, {transform_indices = @transform_1, window_bounds = array<i64: 4, 4>}, {transform_indices = @transform_2, window_bounds = array<i64: 1, 4>}, {transform_indices = @transform_3, window_bounds = array<i64: 1, 4>}, {transform_indices = @transform_4, window_bounds = array<i64: 512, 4>}]} {
    %c0_i32 = arith.constant 0 : i32
    %0 = arith.cmpi eq, %arg2, %c0_i32 : i32
    %1 = arith.extui %0 : i1 to i32
    %c0_i32_0 = arith.constant 0 : i32
    %2 = arith.cmpi ne, %1, %c0_i32_0 : i32
    scf.if %2 {
      %cst_10 = arith.constant 0.000000e+00 : f32
      %12 = vector.broadcast %cst_10 : f32 to vector<512x4xf32>
      %c0_11 = arith.constant 0 : index
      %c0_12 = arith.constant 0 : index
      %13 = vector.load %arg8[%c0_11, %c0_12] : memref<512x4xf32, #tpu.memory_space<vmem>>, vector<512x4xf32>
      tpu.vector_store %arg8[%c0_11, %c0_12], %12 {strides = array<i32>} : memref<512x4xf32, #tpu.memory_space<vmem>>, vector<512x4xf32>,
    } else {
    }
    %c0 = arith.constant 0 : index
    %c0_1 = arith.constant 0 : index
    %3 = vector.load %arg8[%c0, %c0_1] : memref<512x4xf32, #tpu.memory_space<vmem>>, vector<512x4xf32>
    %c0_2 = arith.constant 0 : index
    %c0_3 = arith.constant 0 : index
    %4 = vector.load %arg3[%c0_2, %c0_3] : memref<512x4xbf16, #tpu.memory_space<vmem>>, vector<512x4xbf16>
    %c0_4 = arith.constant 0 : index
    %c0_5 = arith.constant 0 : index
    %5 = vector.load %arg4[%c0_4, %c0_5] : memref<4x4xbf16, #tpu.memory_space<vmem>>, vector<4x4xbf16>
    %cst = arith.constant dense<0.000000e+00> : vector<512x4xf32>
    %6 = tpu.matmul %4, %5, %cst {dimension_numbers = #tpu.dot_dimension_numbers<[1], [0], [0], [1], [0, 0, 1, 1], [], []>} : vector<512x4xbf16>, vector<4x4xbf16>, vector<512x4xf32> -> vector<512x4xf32>
    %7 = arith.addf %3, %6 : vector<512x4xf32>
    %c0_6 = arith.constant 0 : index
    %c0_7 = arith.constant 0 : index
    %8 = vector.load %arg8[%c0_6, %c0_7] : memref<512x4xf32, #tpu.memory_space<vmem>>, vector<512x4xf32>
    tpu.vector_store %arg8[%c0_6, %c0_7], %7 {strides = array<i32>} : memref<512x4xf32, #tpu.memory_space<vmem>>, vector<512x4xf32>,
    %c0_i32_8 = arith.constant 0 : i32
    %9 = arith.cmpi eq, %arg2, %c0_i32_8 : i32
    %10 = arith.extui %9 : i1 to i32
    %c0_i32_9 = arith.constant 0 : i32
    %11 = arith.cmpi ne, %10, %c0_i32_9 : i32
    scf.if %11 {
      %c0_10 = arith.constant 0 : index
      %c0_11 = arith.constant 0 : index
      %12 = vector.load %arg8[%c0_10, %c0_11] : memref<512x4xf32, #tpu.memory_space<vmem>>, vector<512x4xf32>
      %c0_12 = arith.constant 0 : index
      %c0_13 = arith.constant 0 : index
      %13 = vector.load %arg5[%c0_12, %c0_13] : memref<1x4xf32, #tpu.memory_space<vmem>>, vector<1x4xf32>
      %14 = vector.broadcast %13 : vector<1x4xf32> to vector<512x4xf32>
      %15 = arith.mulf %12, %14 : vector<512x4xf32>
      %c0_14 = arith.constant 0 : index
      %c0_15 = arith.constant 0 : index
      %16 = vector.load %arg6[%c0_14, %c0_15] : memref<1x4xf32, #tpu.memory_space<vmem>>, vector<1x4xf32>
      %17 = vector.broadcast %16 : vector<1x4xf32> to vector<512x4xf32>
      %18 = arith.addf %15, %17 : vector<512x4xf32>
      %cst_16 = arith.constant 0.000000e+00 : f32
      %19 = vector.broadcast %cst_16 : f32 to vector<512x4xf32>
      %20 = arith.maximumf %18, %19 : vector<512x4xf32>
      %21 = arith.truncf %20 : vector<512x4xf32> to vector<512x4xbf16>
      %c0_17 = arith.constant 0 : index
      %c0_18 = arith.constant 0 : index
      %22 = vector.load %arg7[%c0_17, %c0_18] : memref<512x4xbf16, #tpu.memory_space<vmem>>, vector<512x4xbf16>
      tpu.vector_store %arg7[%c0_17, %c0_18], %21 {strides = array<i32>} : memref<512x4xbf16, #tpu.memory_space<vmem>>, vector<512x4xbf16>,
    } else {
    }
    return
  }
  func.func @transform_0(%arg0: i32, %arg1: i32, %arg2: i32) -> (i32, i32) {
    %c0_i32 = arith.constant 0 : i32
    return %arg0, %arg2 : i32, i32
  }
  func.func @transform_1(%arg0: i32, %arg1: i32, %arg2: i32) -> (i32, i32) {
    %c0_i32 = arith.constant 0 : i32
    return %arg2, %arg1 : i32, i32
  }
  func.func @transform_2(%arg0: i32, %arg1: i32, %arg2: i32) -> (i32, i32) {
    %c0_i32 = arith.constant 0 : i32
    %c0_i32_0 = arith.constant 0 : i32
    return %c0_i32, %arg1 : i32, i32
  }
  func.func @transform_3(%arg0: i32, %arg1: i32, %arg2: i32) -> (i32, i32) {
    %c0_i32 = arith.constant 0 : i32
    %c0_i32_0 = arith.constant 0 : i32
    return %c0_i32, %arg1 : i32, i32
  }
  func.func @transform_4(%arg0: i32, %arg1: i32, %arg2: i32) -> (i32, i32) {
    %c0_i32 = arith.constant 0 : i32
    return %arg0, %arg1 : i32, i32
  }
}

</mosaic_0001>

<bundles_post_ra>
// kernel: tpu_custom_call.1
= control target key start
LH: loop header
LB: loop body
LE: loop exit
PB: predicated region body
PF: predicated region fallthrough
CT: control target
= control target key end

     0   :  { %vm473_vm0 = vcmask 1041408   ;;  %vm22_vm1 = vcmask 31744   ;;  %v1824_v1 = vmov 0.0   ;;  %vm1423_vm2 = vcmask 27648   ;;  %s2681_s1 = inlined_call_operand.vmem [shape: bf16[4,4], index: 1, kind: input, shape index: {}]   ;;  %s2682_s0 = inlined_call_operand.vmem [shape: bf16[512,4], index: 0, kind: input, shape index: {}]   ;;  %s2683_s2 = inlined_call_operand.vmem [shape: f32[1,4], index: 2, kind: input, shape index: {}]   ;;  %s2684_s3 = inlined_call_operand.vmem [shape: f32[1,4], index: 3, kind: input, shape index: {}]   ;;  %s2685_s4 = inlined_call_operand.vmem [shape: bf16[512,4], index: 4, kind: output, shape index: {}]  }
   0x1   :  { %v1853_v0 = vld [vmem:[%s2681_s1] sm:$0x3]  ;;  %25 = vst.msk [vmem:[#allocation2 + $0x10] sm:$0xff] %vm22_vm1, %v1824_v1  ;;  %23 = vst.msk [vmem:[#allocation2] sm:$0xff] %vm22_vm1, %v1824_v1  ;;  %v1792_v5 = vld [vmem:[%s2682_s0 + $0x8] sm:$0xff]  }
   0x2   :  { %24 = vst.msk [vmem:[#allocation2 + $0x8] sm:$0xff] %vm22_vm1, %v1824_v1  ;;  %26 = vst.msk [vmem:[#allocation2 + $0x18] sm:$0xff] %vm22_vm1, %v1824_v1  ;;  %1787 = vmatprep.subr.msk.bf16.mxu0 %vm473_vm0, %v1853_v0  ;;  %1788 = vmatprep.subr.msk.bf16.mxu1 %vm473_vm0, %v1853_v0  ;;  %v475_v2 = vsel %vm473_vm0, %v1853_v0, 0  ;;  %v1790_v3 = vld [vmem:[%s2682_s0] sm:$0xff]   ;;  %v1793_v6 = vld [vmem:[%s2682_s0 + $0x88] sm:$0xff]  }
   0x3   :  { %27 = vst.msk [vmem:[#allocation2 + $0x20] sm:$0xff] %vm22_vm1, %v1824_v1  ;;  %28 = vst.msk [vmem:[#allocation2 + $0x28] sm:$0xff] %vm22_vm1, %v1824_v1  ;;  %1720 = vmatpush3.bf16.msra.mxu0 %v475_v2  ;;  %1786 = vmatpush3.bf16.msra.mxu1 %v475_v2  ;;  %v1791_v4 = vld [vmem:[%s2682_s0 + $0x80] sm:$0xff]   ;;  %v1794_v7 = vld [vmem:[%s2682_s0 + $0x10] sm:$0xff]  }
   0x4   :  { %29 = vst.msk [vmem:[#allocation2 + $0x30] sm:$0xff] %vm22_vm1, %v1824_v1  ;;  %30 = vst.msk [vmem:[#allocation2 + $0x38] sm:$0xff] %vm22_vm1, %v1824_v1  ;;  %1721 = vmatprep.mubr.msk.bf16.mxu0 %vm22_vm1, %v1790_v3  ;;  %1753 = vmatprep.mubr.msk.bf16.mxu1 %vm22_vm1, %v1791_v4  ;;  %v1795_v8 = vld [vmem:[%s2682_s0 + $0x90] sm:$0xff]   ;;  %v1796_v9 = vld [vmem:[%s2682_s0 + $0x18] sm:$0xff]  }
   0x5   :  { %31 = vst.msk [vmem:[#allocation2 + $0x40] sm:$0xff] %vm22_vm1, %v1824_v1  ;;  %32 = vst.msk [vmem:[#allocation2 + $0x48] sm:$0xff] %vm22_vm1, %v1824_v1  ;;  %v1797_v10 = vld [vmem:[%s2682_s0 + $0x98] sm:$0xff]   ;;  %v1798_v11 = vld [vmem:[%s2682_s0 + $0x20] sm:$0xff]  }
   0x6   :  { %33 = vst.msk [vmem:[#allocation2 + $0x50] sm:$0xff] %vm22_vm1, %v1824_v1  ;;  %34 = vst.msk [vmem:[#allocation2 + $0x58] sm:$0xff] %vm22_vm1, %v1824_v1  ;;  %1722 = vmatmul.mubr.msk.bf16.vlgmr.msra.gmra.mrb[0].mxu0 %vm22_vm1, %v1792_v5  ;;  %1754 = vmatmul.mubr.msk.bf16.vlgmr.msra.gmra.mrb[0].mxu1 %vm22_vm1, %v1793_v6  ;;  %v1799_v12 = vld [vmem:[%s2682_s0 + $0xa0] sm:$0xff]   ;;  %v1800_v13 = vld [vmem:[%s2682_s0 + $0x28] sm:$0xff]  }
   0x7   :  { %35 = vst.msk [vmem:[#allocation2 + $0x60] sm:$0xff] %vm22_vm1, %v1824_v1  ;;  %36 = vst.msk [vmem:[#allocation2 + $0x68] sm:$0xff] %vm22_vm1, %v1824_v1  ;;  %1725 = vmatprep.mubr.msk.bf16.mxu0 %vm22_vm1, %v1794_v7  ;;  %1757 = vmatprep.mubr.msk.bf16.mxu1 %vm22_vm1, %v1795_v8  ;;  %v1801_v14 = vld [vmem:[%s2682_s0 + $0xa8] sm:$0xff]   ;;  %v1802_v15 = vld [vmem:[%s2682_s0 + $0x30] sm:$0xff]  }
   0x8   :  { %37 = vst.msk [vmem:[#allocation2 + $0x70] sm:$0xff] %vm22_vm1, %v1824_v1  ;;  %38 = vst.msk [vmem:[#allocation2 + $0x78] sm:$0xff] %vm22_vm1, %v1824_v1  ;;  %v1803_v16 = vld [vmem:[%s2682_s0 + $0xb0] sm:$0xff]   ;;  %v1804_v17 = vld [vmem:[%s2682_s0 + $0x38] sm:$0xff]  }
   0x9   :  { %39 = vst.msk [vmem:[#allocation2 + $0x80] sm:$0xff] %vm22_vm1, %v1824_v1  ;;  %40 = vst.msk [vmem:[#allocation2 + $0x88] sm:$0xff] %vm22_vm1, %v1824_v1  ;;  %v1805_v18 = vld [vmem:[%s2682_s0 + $0xb8] sm:$0xff]   ;;  %v1806_v19 = vld [vmem:[%s2682_s0 + $0x40] sm:$0xff]  }
   0xa   :  { %41 = vst.msk [vmem:[#allocation2 + $0x90] sm:$0xff] %vm22_vm1, %v1824_v1  ;;  %42 = vst.msk [vmem:[#allocation2 + $0x98] sm:$0xff] %vm22_vm1, %v1824_v1  ;;  %v1807_v20 = vld [vmem:[%s2682_s0 + $0xc0] sm:$0xff]   ;;  %v1808_v21 = vld [vmem:[%s2682_s0 + $0x48] sm:$0xff]  }
   0xb   :  { %43 = vst.msk [vmem:[#allocation2 + $0xa0] sm:$0xff] %vm22_vm1, %v1824_v1  ;;  %44 = vst.msk [vmem:[#allocation2 + $0xa8] sm:$0xff] %vm22_vm1, %v1824_v1  ;;  %v1809_v22 = vld [vmem:[%s2682_s0 + $0xc8] sm:$0xff]   ;;  %v1810_v23 = vld [vmem:[%s2682_s0 + $0x50] sm:$0xff]  }
   0xc   :  { %45 = vst.msk [vmem:[#allocation2 + $0xb0] sm:$0xff] %vm22_vm1, %v1824_v1  ;;  %46 = vst.msk [vmem:[#allocation2 + $0xb8] sm:$0xff] %vm22_vm1, %v1824_v1  ;;  %v1811_v24 = vld [vmem:[%s2682_s0 + $0xd0] sm:$0xff]   ;;  %v1812_v25 = vld [vmem:[%s2682_s0 + $0x58] sm:$0xff]  }
   0xd   :  { %47 = vst.msk [vmem:[#allocation2 + $0xc0] sm:$0xff] %vm22_vm1, %v1824_v1  ;;  %48 = vst.msk [vmem:[#allocation2 + $0xc8] sm:$0xff] %vm22_vm1, %v1824_v1  ;;  %v1813_v26 = vld [vmem:[%s2682_s0 + $0xd8] sm:$0xff]   ;;  %v1814_v27 = vld [vmem:[%s2682_s0 + $0x60] sm:$0xff]  }
   0xe   :  { %49 = vst.msk [vmem:[#allocation2 + $0xd0] sm:$0xff] %vm22_vm1, %v1824_v1  ;;  %50 = vst.msk [vmem:[#allocation2 + $0xd8] sm:$0xff] %vm22_vm1, %v1824_v1  ;;  %1726 = vmatmul.mubr.msk.bf16.gmra.mrb[4].mxu0 %vm22_vm1, %v1796_v9  ;;  %1758 = vmatmul.mubr.msk.bf16.gmra.mrb[4].mxu1 %vm22_vm1, %v1797_v10  ;;  %v1815_v28 = vld [vmem:[%s2682_s0 + $0xe0] sm:$0xff]   ;;  %v1816_v29 = vld [vmem:[%s2682_s0 + $0x68] sm:$0xff]  }
   0xf   :  { %51 = vst.msk [vmem:[#allocation2 + $0xe0] sm:$0xff] %vm22_vm1, %v1824_v1  ;;  %52 = vst.msk [vmem:[#allocation2 + $0xe8] sm:$0xff] %vm22_vm1, %v1824_v1  ;;  %1729 = vmatprep.mubr.msk.bf16.mxu0 %vm22_vm1, %v1798_v11  ;;  %1761 = vmatprep.mubr.msk.bf16.mxu1 %vm22_vm1, %v1799_v12  ;;  %v1817_v30 = vld [vmem:[%s2682_s0 + $0xe8] sm:$0xff]   ;;  %v1818_v31 = vld [vmem:[%s2682_s0 + $0x70] sm:$0xff]  }
  0x10   :  { %53 = vst.msk [vmem:[#allocation2 + $0xf0] sm:$0xff] %vm22_vm1, %v1824_v1  ;;  %54 = vst.msk [vmem:[#allocation2 + $0xf8] sm:$0xff] %vm22_vm1, %v1824_v1  ;;  %v1819_v32 = vld [vmem:[%s2682_s0 + $0xf0] sm:$0xff]   ;;  %v1820_v33 = vld [vmem:[%s2682_s0 + $0x78] sm:$0xff]  }
  0x11   :  { %55 = vst.msk [vmem:[#allocation2 + $0x100] sm:$0xff] %vm22_vm1, %v1824_v1  ;;  %56 = vst.msk [vmem:[#allocation2 + $0x108] sm:$0xff] %vm22_vm1, %v1824_v1  ;;  %v1821_v34 = vld [vmem:[%s2682_s0 + $0xf8] sm:$0xff]   ;;  %v89_v35 = vld [vmem:[#allocation2 + $0x10] sm:$0xff] }
  0x12   :  { %57 = vst.msk [vmem:[#allocation2 + $0x110] sm:$0xff] %vm22_vm1, %v1824_v1  ;;  %58 = vst.msk [vmem:[#allocation2 + $0x118] sm:$0xff] %vm22_vm1, %v1824_v1  ;;  %v87_v37 = vld [vmem:[#allocation2] sm:$0xff]  ;;  %v90_v40 = vld [vmem:[#allocation2 + $0x18] sm:$0xff] }
  0x13   :  { %59 = vst.msk [vmem:[#allocation2 + $0x120] sm:$0xff] %vm22_vm1, %v1824_v1  ;;  %60 = vst.msk [vmem:[#allocation2 + $0x128] sm:$0xff] %vm22_vm1, %v1824_v1  ;;  %v88_v45 = vld [vmem:[#allocation2 + $0x8] sm:$0xff]  ;;  %v93_v59 = vld [vmem:[#allocation2 + $0x30] sm:$0xff] }
  0x14   :  { %61 = vst.msk [vmem:[#allocation2 + $0x130] sm:$0xff] %vm22_vm1, %v1824_v1  ;;  %62 = vst.msk [vmem:[#allocation2 + $0x138] sm:$0xff] %vm22_vm1, %v1824_v1  ;;  %v91_v61 = vld [vmem:[#allocation2 + $0x20] sm:$0xff]  ;;  %v92_v6 = vld [vmem:[#allocation2 + $0x28] sm:$0xff] }
  0x15   :  { %63 = vst.msk [vmem:[#allocation2 + $0x140] sm:$0xff] %vm22_vm1, %v1824_v1  ;;  %64 = vst.msk [vmem:[#allocation2 + $0x148] sm:$0xff] %vm22_vm1, %v1824_v1  ;;  %v2128_v62 = vld [vmem:[%s2683_s2] ss:$0 sm:$0xff] }
  0x16   :  { %65 = vst.msk [vmem:[#allocation2 + $0x150] sm:$0xff] %vm22_vm1, %v1824_v1  ;;  %66 = vst.msk [vmem:[#allocation2 + $0x158] sm:$0xff] %vm22_vm1, %v1824_v1  ;;  %1730 = vmatmul.mubr.msk.bf16.gmra.mrb[8].mxu0 %vm22_vm1, %v1800_v13  ;;  %1762 = vmatmul.mubr.msk.bf16.gmra.mrb[8].mxu1 %vm22_vm1, %v1801_v14  ;;  %v2133_v8 = vld [vmem:[%s2684_s3] ss:$0 sm:$0xff] }
  0x17   :  { %67 = vst.msk [vmem:[#allocation2 + $0x160] sm:$0xff] %vm22_vm1, %v1824_v1  ;;  %68 = vst.msk [vmem:[#allocation2 + $0x168] sm:$0xff] %vm22_vm1, %v1824_v1  ;;  %1733 = vmatprep.mubr.msk.bf16.mxu0 %vm22_vm1, %v1802_v15  ;;  %1765 = vmatprep.mubr.msk.bf16.mxu1 %vm22_vm1, %v1803_v16 }
  0x18   :  { %69 = vst.msk [vmem:[#allocation2 + $0x170] sm:$0xff] %vm22_vm1, %v1824_v1  ;;  %70 = vst.msk [vmem:[#allocation2 + $0x178] sm:$0xff] %vm22_vm1, %v1824_v1  ;;  %v119_v39 = vld [vmem:[#allocation2 + $0x100] sm:$0xff]  ;;  %v120_v50 = vld [vmem:[#allocation2 + $0x108] sm:$0xff] }
  0x19   :  { %71 = vst.msk [vmem:[#allocation2 + $0x180] sm:$0xff] %vm22_vm1, %v1824_v1  ;;  %72 = vst.msk [vmem:[#allocation2 + $0x188] sm:$0xff] %vm22_vm1, %v1824_v1  ;;  %v121_v36 = vld [vmem:[#allocation2 + $0x110] sm:$0xff]  ;;  %v122_v44 = vld [vmem:[#allocation2 + $0x118] sm:$0xff] }
  0x1a   :  { %73 = vst.msk [vmem:[#allocation2 + $0x190] sm:$0xff] %vm22_vm1, %v1824_v1  ;;  %74 = vst.msk [vmem:[#allocation2 + $0x198] sm:$0xff] %vm22_vm1, %v1824_v1  ;;  %v123_v0 = vld [vmem:[#allocation2 + $0x120] sm:$0xff]  ;;  %v124_v13 = vld [vmem:[#allocation2 + $0x128] sm:$0xff] }
  0x1b   :  { %75 = vst.msk [vmem:[#allocation2 + $0x1a0] sm:$0xff] %vm22_vm1, %v1824_v1  ;;  %76 = vst.msk [vmem:[#allocation2 + $0x1a8] sm:$0xff] %vm22_vm1, %v1824_v1  ;;  %v125_v60 = vld [vmem:[#allocation2 + $0x130] sm:$0xff]  ;;  %v126_v5 = vld [vmem:[#allocation2 + $0x138] sm:$0xff] }
  0x1c   :  { %77 = vst.msk [vmem:[#allocation2 + $0x1b0] sm:$0xff] %vm22_vm1, %v1824_v1  ;;  %78 = vst.msk [vmem:[#allocation2 + $0x1b8] sm:$0xff] %vm22_vm1, %v1824_v1 }
  0x1d   :  { %79 = vst.msk [vmem:[#allocation2 + $0x1c0] sm:$0xff] %vm22_vm1, %v1824_v1  ;;  %80 = vst.msk [vmem:[#allocation2 + $0x1c8] sm:$0xff] %vm22_vm1, %v1824_v1 }
  0x1e   :  { %81 = vst.msk [vmem:[#allocation2 + $0x1d0] sm:$0xff] %vm22_vm1, %v1824_v1  ;;  %82 = vst.msk [vmem:[#allocation2 + $0x1d8] sm:$0xff] %vm22_vm1, %v1824_v1  ;;  %1734 = vmatmul.mubr.msk.bf16.gmra.mrb[12].mxu0 %vm22_vm1, %v1804_v17  ;;  %1766 = vmatmul.mubr.msk.bf16.gmra.mrb[12].mxu1 %vm22_vm1, %v1805_v18 }
  0x1f   :  { %83 = vst.msk [vmem:[#allocation2 + $0x1e0] sm:$0xff] %vm22_vm1, %v1824_v1  ;;  %84 = vst.msk [vmem:[#allocation2 + $0x1e8] sm:$0xff] %vm22_vm1, %v1824_v1  ;;  %1737 = vmatprep.mubr.msk.bf16.mxu0 %vm22_vm1, %v1806_v19  ;;  %1769 = vmatprep.mubr.msk.bf16.mxu1 %vm22_vm1, %v1807_v20 }
  0x20   :  { %85 = vst.msk [vmem:[#allocation2 + $0x1f0] sm:$0xff] %vm22_vm1, %v1824_v1  ;;  %86 = vst.msk [vmem:[#allocation2 + $0x1f8] sm:$0xff] %vm22_vm1, %v1824_v1  ;;  %v94_v1 = vld [vmem:[#allocation2 + $0x38] sm:$0xff] }
  0x26   :  { %1738 = vmatmul.mubr.msk.bf16.gmra.mrb[16].mxu0 %vm22_vm1, %v1808_v21  ;;  %1770 = vmatmul.mubr.msk.bf16.gmra.mrb[16].mxu1 %vm22_vm1, %v1809_v22 }
  0x27   :  { %1741 = vmatprep.mubr.msk.bf16.mxu0 %vm22_vm1, %v1810_v23  ;;  %1773 = vmatprep.mubr.msk.bf16.mxu1 %vm22_vm1, %v1811_v24 }
  0x2e   :  { %1742 = vmatmul.mubr.msk.bf16.gmra.mrb[20].mxu0 %vm22_vm1, %v1812_v25  ;;  %1774 = vmatmul.mubr.msk.bf16.gmra.mrb[20].mxu1 %vm22_vm1, %v1813_v26 }
  0x2f   :  { %1745 = vmatprep.mubr.msk.bf16.mxu0 %vm22_vm1, %v1814_v27  ;;  %1777 = vmatprep.mubr.msk.bf16.mxu1 %vm22_vm1, %v1815_v28 }
  0x36   :  { %1746 = vmatmul.mubr.msk.bf16.gmra.mrb[24].mxu0 %vm22_vm1, %v1816_v29  ;;  %1778 = vmatmul.mubr.msk.bf16.gmra.mrb[24].mxu1 %vm22_vm1, %v1817_v30 }
  0x37   :  { %1749 = vmatprep.mubr.msk.bf16.mxu0 %vm22_vm1, %v1818_v31  ;;  %1781 = vmatprep.mubr.msk.bf16.mxu1 %vm22_vm1, %v1819_v32 }
  0x3e   :  { %1750 = vmatmul.mubr.msk.bf16.gmra.mrb[28].mxu0 %vm22_vm1, %v1820_v33  ;;  %1782 = vmatmul.mubr.msk.bf16.gmra.mrb[28].mxu1 %vm22_vm1, %v1821_v34 }
  0xd9   :  { %v1723_v38 = vpop.f32.mrb[0].mxu0  ;;  %v1755_v42 = vpop.f32.mrb[0].mxu1 }
  0xda   :  { %v768_v41 = vadd.f32 %v1723_v38, %v89_v35  ;;  %v511_v43 = vpop.f32.mrb[1].mxu0  ;;  %v800_v46 = vadd.f32 %v1755_v42, %v121_v36  ;;  %v639_v48 = vpop.f32.mrb[1].mxu1 }
  0xdb   :  { %v766_v47 = vadd.f32 %v511_v43, %v87_v37  ;;  %v1724_v49 = vpop.f32.mrb[2].mxu0  ;;  %v798_v51 = vadd.f32 %v639_v48, %v119_v39  ;;  %v1756_v53 = vpop.f32.mrb[2].mxu1 }
  0xdc   :  { %832 = vst.msk [vmem:[#allocation2 + $0x10] sm:$0xff] %vm22_vm1, %v768_v41  ;;  %v769_v52 = vadd.f32 %v1724_v49, %v90_v40  ;;  %v514_v54 = vpop.f32.mrb[3].mxu0  ;;  %864 = vst.msk [vmem:[#allocation2 + $0x110] sm:$0xff] %vm22_vm1, %v800_v46  ;;  %v801_v55 = vadd.f32 %v1756_v53, %v122_v44  ;;  %v642_v57 = vpop.f32.mrb[3].mxu1 }
  0xdd   :  { %830 = vst.msk [vmem:[#allocation2] sm:$0xff] %vm22_vm1, %v766_v47  ;;  %v767_v56 = vadd.f32 %v514_v54, %v88_v45  ;;  %862 = vst.msk [vmem:[#allocation2 + $0x100] sm:$0xff] %vm22_vm1, %v798_v51  ;;  %v799_v58 = vadd.f32 %v642_v57, %v120_v50 }
  0xde   :  { %833 = vst.msk [vmem:[#allocation2 + $0x18] sm:$0xff] %vm22_vm1, %v769_v52  ;;  %865 = vst.msk [vmem:[#allocation2 + $0x118] sm:$0xff] %vm22_vm1, %v801_v55 }
  0xdf   :  { %831 = vst.msk [vmem:[#allocation2 + $0x8] sm:$0xff] %vm22_vm1, %v767_v56  ;;  %863 = vst.msk [vmem:[#allocation2 + $0x108] sm:$0xff] %vm22_vm1, %v799_v58 }
  0xe1   :  { %v1727_v63 = vpop.f32.mrb[4].mxu0  ;;  %v1759_v3 = vpop.f32.mrb[4].mxu1 }
  0xe2   :  { %v772_v2 = vadd.f32 %v1727_v63, %v93_v59  ;;  %v527_v4 = vpop.f32.mrb[5].mxu0  ;;  %v804_v9 = vadd.f32 %v1759_v3, %v125_v60  ;;  %v655_v11 = vpop.f32.mrb[5].mxu1 }
  0xe3   :  { %v899_v7 = vld [vmem:[#allocation2 + $0x10] sm:$0xff]  ;;  %v770_v10 = vadd.f32 %v527_v4, %v91_v61  ;;  %v1728_v12 = vpop.f32.mrb[6].mxu0  ;;  %v802_v17 = vadd.f32 %v655_v11, %v123_v0  ;;  %v1760_v19 = vpop.f32.mrb[6].mxu1 }
  0xe4   :  { %v970_v14 = vmul.f32 %v2128_v62, %v899_v7  ;;  %v931_v15 = vld [vmem:[#allocation2 + $0x110] sm:$0xff]  ;;  %v897_v16 = vld [vmem:[#allocation2] sm:$0xff]  ;;  %836 = vst.msk [vmem:[#allocation2 + $0x30] sm:$0xff] %vm22_vm1, %v772_v2  ;;  %v773_v18 = vadd.f32 %v1728_v12, %v94_v1  ;;  %v530_v20 = vpop.f32.mrb[7].mxu0  ;;  %868 = vst.msk [vmem:[#allocation2 + $0x130] sm:$0xff] %vm22_vm1, %v804_v9  ;;  %v805_v25 = vadd.f32 %v1760_v19, %v126_v5  ;;  %v658_v27 = vpop.f32.mrb[7].mxu1 }
  0xe5   :  { %v1002_v21 = vmul.f32 %v2128_v62, %v931_v15  ;;  %v968_v22 = vmul.f32 %v2128_v62, %v897_v16  ;;  %v929_v23 = vld [vmem:[#allocation2 + $0x100] sm:$0xff]  ;;  %v900_v24 = vld [vmem:[#allocation2 + $0x18] sm:$0xff]  ;;  %834 = vst.msk [vmem:[#allocation2 + $0x20] sm:$0xff] %vm22_vm1, %v770_v10  ;;  %v771_v26 = vadd.f32 %v530_v20, %v92_v6  ;;  %866 = vst.msk [vmem:[#allocation2 + $0x120] sm:$0xff] %vm22_vm1, %v802_v17 }
  0xe6   :  { %v1041_v28 = vadd.f32 %v2133_v8, %v970_v14  ;;  %v1000_v29 = vmul.f32 %v2128_v62, %v929_v23  ;;  %v971_v30 = vmul.f32 %v2128_v62, %v900_v24  ;;  %v932_v31 = vld [vmem:[#allocation2 + $0x118] sm:$0xff]  ;;  %v898_v32 = vld [vmem:[#allocation2 + $0x8] sm:$0xff]  ;;  %837 = vst.msk [vmem:[#allocation2 + $0x38] sm:$0xff] %vm22_vm1, %v773_v18  ;;  %v803_v33 = vadd.f32 %v658_v27, %v124_v13 }
  0xe7   :  { %v1073_v34 = vadd.f32 %v2133_v8, %v1002_v21  ;;  %v1039_v35 = vadd.f32 %v2133_v8, %v968_v22  ;;  %v1003_v36 = vmul.f32 %v2128_v62, %v932_v31  ;;  %v969_v37 = vmul.f32 %v2128_v62, %v898_v32  ;;  %v930_v38 = vld [vmem:[#allocation2 + $0x108] sm:$0xff]  ;;  %869 = vst.msk [vmem:[#allocation2 + $0x138] sm:$0xff] %vm22_vm1, %v805_v25 }
  0xe8   :  { %835 = vst.msk [vmem:[#allocation2 + $0x28] sm:$0xff] %vm22_vm1, %v771_v26  ;;  %v1105_v39 = vmax.f32 %v1041_v28, 0.0  ;;  %v1071_v40 = vadd.f32 %v2133_v8, %v1000_v29  ;;  %v1042_v41 = vadd.f32 %v2133_v8, %v971_v30  ;;  %v1001_v42 = vmul.f32 %v2128_v62, %v930_v38  ;;  %867 = vst.msk [vmem:[#allocation2 + $0x128] sm:$0xff] %vm22_vm1, %v803_v33  ;;  %v97_v29 = vld [vmem:[#allocation2 + $0x50] sm:$0xff] }
  0xe9   :  { %v1137_v43 = vmax.f32 %v1073_v34, 0.0  ;;  %v1103_v44 = vmax.f32 %v1039_v35, 0.0  ;;  %v1074_v45 = vadd.f32 %v2133_v8, %v1003_v36  ;;  %v1040_v46 = vadd.f32 %v2133_v8, %v969_v37  ;;  %v2158_v47 = vpop.f32.mrb[8].mxu0  ;;  %v2161_v52 = vpop.f32.mrb[8].mxu1  ;;  %v129_v34 = vld [vmem:[#allocation2 + $0x150] sm:$0xff]  ;;  %v95_v35 = vld [vmem:[#allocation2 + $0x40] sm:$0xff] }
  0xea   :  { %v1624_v48 = vpack.c.bf16 %v1105_v39, %v1105_v39  ;;  %v1135_v49 = vmax.f32 %v1071_v40, 0.0  ;;  %v1106_v50 = vmax.f32 %v1042_v41, 0.0  ;;  %v1072_v51 = vadd.f32 %v2133_v8, %v1001_v42  ;;  %v2163_v53 = vpop.f32.mrb[9].mxu0  ;;  %v2165_v59 = vpop.f32.mrb[9].mxu1  ;;  %v127_v36 = vld [vmem:[#allocation2 + $0x140] sm:$0xff]  ;;  %v98_v42 = vld [vmem:[#allocation2 + $0x58] sm:$0xff] }
  0xeb   :  { %v1656_v54 = vpack.c.bf16 %v1137_v43, %v1137_v43  ;;  %v1622_v55 = vpack.c.bf16 %v1103_v44, %v1103_v44  ;;  %v1138_v56 = vmax.f32 %v1074_v45, 0.0  ;;  %v1104_v57 = vmax.f32 %v1040_v46, 0.0  ;;  %v903_v58 = vld [vmem:[#allocation2 + $0x30] sm:$0xff]  ;;  %v2167_v60 = vpop.f32.mrb[10].mxu0  ;;  %v2174_v4 = vpop.f32.mrb[10].mxu1  ;;  %v130_v43 = vld [vmem:[#allocation2 + $0x158] sm:$0xff] }
  0xec   :  { %1426 = vst.msk [vmem:[%s2685_s4 + $0x8] sm:$0xf] %vm1423_vm2, %v1624_v48  ;;  %v1654_v61 = vpack.c.bf16 %v1135_v49, %v1135_v49  ;;  %v1625_v63 = vpack.c.bf16 %v1106_v50, %v1106_v50  ;;  %v1136_v0 = vmax.f32 %v1072_v51, 0.0  ;;  %v974_v1 = vmul.f32 %v2128_v62, %v903_v58  ;;  %v935_v2 = vld [vmem:[#allocation2 + $0x130] sm:$0xff]  ;;  %v901_v3 = vld [vmem:[#allocation2 + $0x20] sm:$0xff]  ;;  %v2176_v5 = vpop.f32.mrb[11].mxu0 }
  0xed   :  { %1458 = vst.msk [vmem:[%s2685_s4 + $0x88] sm:$0xf] %vm1423_vm2, %v1656_v54  ;;  %1424 = vst.msk [vmem:[%s2685_s4] sm:$0xf] %vm1423_vm2, %v1622_v55  ;;  %v1657_v6 = vpack.c.bf16 %v1138_v56, %v1138_v56  ;;  %v1623_v7 = vpack.c.bf16 %v1104_v57, %v1104_v57  ;;  %v1006_v9 = vmul.f32 %v2128_v62, %v935_v2  ;;  %v933_v11 = vld [vmem:[#allocation2 + $0x120] sm:$0xff]  ;;  %v904_v12 = vld [vmem:[#allocation2 + $0x38] sm:$0xff] }
  0xee   :  { %v972_v10 = vmul.f32 %v2128_v62, %v901_v3  ;;  %v2188_v13 = vpop.f32.mrb[11].mxu1  ;;  %1456 = vst.msk [vmem:[%s2685_s4 + $0x80] sm:$0xf] %vm1423_vm2, %v1654_v61  ;;  %1427 = vst.msk [vmem:[%s2685_s4 + $0xc] sm:$0xf] %vm1423_vm2, %v1625_v63  ;;  %v1655_v14 = vpack.c.bf16 %v1136_v0, %v1136_v0  ;;  %v1045_v15 = vadd.f32 %v2133_v8, %v974_v1  ;;  %v936_v18 = vld [vmem:[#allocation2 + $0x138] sm:$0xff] }
  0xef   :  { %v1004_v16 = vmul.f32 %v2128_v62, %v933_v11  ;;  %v975_v17 = vmul.f32 %v2128_v62, %v904_v12  ;;  %v902_v19 = vld [vmem:[#allocation2 + $0x28] sm:$0xff]  ;;  %1459 = vst.msk [vmem:[%s2685_s4 + $0x8c] sm:$0xf] %vm1423_vm2, %v1657_v6  ;;  %1425 = vst.msk [vmem:[%s2685_s4 + $0x4] sm:$0xf] %vm1423_vm2, %v1623_v7  ;;  %v1077_v20 = vadd.f32 %v2133_v8, %v1006_v9  ;;  %v101_v0 = vld [vmem:[#allocation2 + $0x70] sm:$0xff] }
  0xf0   :  { %v1043_v21 = vadd.f32 %v2133_v8, %v972_v10  ;;  %v1007_v22 = vmul.f32 %v2128_v62, %v936_v18  ;;  %v973_v23 = vmul.f32 %v2128_v62, %v902_v19  ;;  %v934_v24 = vld [vmem:[#allocation2 + $0x128] sm:$0xff]  ;;  %1457 = vst.msk [vmem:[%s2685_s4 + $0x84] sm:$0xf] %vm1423_vm2, %v1655_v14  ;;  %v1109_v25 = vmax.f32 %v1045_v15, 0.0  ;;  %v133_v1 = vld [vmem:[#allocation2 + $0x170] sm:$0xff]  ;;  %v99_v2 = vld [vmem:[#allocation2 + $0x60] sm:$0xff] }
  0xf1   :  { %v1075_v26 = vadd.f32 %v2133_v8, %v1004_v16  ;;  %v1046_v27 = vadd.f32 %v2133_v8, %v975_v17  ;;  %v1005_v28 = vmul.f32 %v2128_v62, %v934_v24  ;;  %v1141_v30 = vmax.f32 %v1077_v20, 0.0  ;;  %v1735_v37 = vpop.f32.mrb[12].mxu0  ;;  %v1767_v44 = vpop.f32.mrb[12].mxu1  ;;  %v96_v51 = vld [vmem:[#allocation2 + $0x48] sm:$0xff]  ;;  %v131_v11 = vld [vmem:[#allocation2 + $0x160] sm:$0xff]  ;;  %v102_v12 = vld [vmem:[#allocation2 + $0x78] sm:$0xff] }
  0xf2   :  { %v1107_v31 = vmax.f32 %v1043_v21, 0.0  ;;  %v1078_v32 = vadd.f32 %v2133_v8, %v1007_v22  ;;  %v1044_v33 = vadd.f32 %v2133_v8, %v973_v23  ;;  %v1628_v38 = vpack.c.bf16 %v1109_v25, %v1109_v25  ;;  %v559_v45 = vpop.f32.mrb[13].mxu0  ;;  %v128_v54 = vld [vmem:[#allocation2 + $0x148] sm:$0xff]  ;;  %v687_v55 = vpop.f32.mrb[13].mxu1  ;;  %v134_v14 = vld [vmem:[#allocation2 + $0x178] sm:$0xff]  ;;  %v105_v21 = vld [vmem:[#allocation2 + $0x90] sm:$0xff] }
  0xf3   :  { %v1139_v39 = vmax.f32 %v1075_v26, 0.0  ;;  %v1110_v40 = vmax.f32 %v1046_v27, 0.0  ;;  %v1076_v41 = vadd.f32 %v2133_v8, %v1005_v28  ;;  %v1660_v46 = vpack.c.bf16 %v1141_v30, %v1141_v30  ;;  %v1736_v56 = vpop.f32.mrb[14].mxu0  ;;  %v1768_v3 = vpop.f32.mrb[14].mxu1  ;;  %v100_v18 = vld [vmem:[#allocation2 + $0x68] sm:$0xff]  ;;  %v137_v25 = vld [vmem:[#allocation2 + $0x190] sm:$0xff] }
  0xf4   :  { %v1626_v48 = vpack.c.bf16 %v1107_v31, %v1107_v31  ;;  %v1142_v49 = vmax.f32 %v1078_v32, 0.0  ;;  %v1108_v50 = vmax.f32 %v1044_v33, 0.0  ;;  %1430 = vst.msk [vmem:[%s2685_s4 + $0x18] sm:$0xf] %vm1423_vm2, %v1628_v38  ;;  %v776_v63 = vadd.f32 %v2158_v47, %v97_v29  ;;  %v562_v6 = vpop.f32.mrb[15].mxu0  ;;  %v690_v15 = vpop.f32.mrb[15].mxu1 }
  0xf5   :  { %v1658_v57 = vpack.c.bf16 %v1139_v39, %v1139_v39  ;;  %v1629_v58 = vpack.c.bf16 %v1110_v40, %v1110_v40  ;;  %v1140_v61 = vmax.f32 %v1076_v41, 0.0  ;;  %1462 = vst.msk [vmem:[%s2685_s4 + $0x98] sm:$0xf] %vm1423_vm2, %v1660_v46  ;;  %v808_v10 = vadd.f32 %v2161_v52, %v129_v34  ;;  %v132_v19 = vld [vmem:[#allocation2 + $0x168] sm:$0xff]  ;;  %v135_v29 = vld [vmem:[#allocation2 + $0x180] sm:$0xff]  ;;  %v106_v30 = vld [vmem:[#allocation2 + $0x98] sm:$0xff] }
  0xf6   :  { %1428 = vst.msk [vmem:[%s2685_s4 + $0x10] sm:$0xf] %vm1423_vm2, %v1626_v48  ;;  %v1661_v7 = vpack.c.bf16 %v1142_v49, %v1142_v49  ;;  %v1627_v9 = vpack.c.bf16 %v1108_v50, %v1108_v50  ;;  %v774_v47 = vadd.f32 %v2163_v53, %v95_v35  ;;  %v806_v52 = vadd.f32 %v2165_v59, %v127_v36  ;;  %v138_v34 = vld [vmem:[#allocation2 + $0x198] sm:$0xff]  ;;  %v104_v35 = vld [vmem:[#allocation2 + $0x88] sm:$0xff] }
  0xf7   :  { %1460 = vst.msk [vmem:[%s2685_s4 + $0x90] sm:$0xf] %vm1423_vm2, %v1658_v57  ;;  %1431 = vst.msk [vmem:[%s2685_s4 + $0x1c] sm:$0xf] %vm1423_vm2, %v1629_v58  ;;  %v1659_v16 = vpack.c.bf16 %v1140_v61, %v1140_v61  ;;  %v777_v53 = vadd.f32 %v2167_v60, %v98_v42  ;;  %v809_v17 = vadd.f32 %v2174_v4, %v130_v43  ;;  %v136_v40 = vld [vmem:[#allocation2 + $0x188] sm:$0xff] }
  0xf8   :  { %840 = vst.msk [vmem:[#allocation2 + $0x50] sm:$0xff] %vm22_vm1, %v776_v63  ;;  %872 = vst.msk [vmem:[#allocation2 + $0x150] sm:$0xff] %vm22_vm1, %v808_v10  ;;  %v775_v59 = vadd.f32 %v2176_v5, %v96_v51  ;;  %v807_v60 = vadd.f32 %v2188_v13, %v128_v54  ;;  %v780_v4 = vadd.f32 %v1735_v37, %v101_v0  ;;  %v103_v13 = vld [vmem:[#allocation2 + $0x80] sm:$0xff] }
  0xf9   :  { %1463 = vst.msk [vmem:[%s2685_s4 + $0x9c] sm:$0xf] %vm1423_vm2, %v1661_v7  ;;  %1429 = vst.msk [vmem:[%s2685_s4 + $0x14] sm:$0xf] %vm1423_vm2, %v1627_v9  ;;  %v812_v20 = vadd.f32 %v1767_v44, %v133_v1  ;;  %v778_v22 = vadd.f32 %v559_v45, %v99_v2  ;;  %v810_v23 = vadd.f32 %v687_v55, %v131_v11  ;;  %v1739_v28 = vpop.f32.mrb[16].mxu0  ;;  %v1771_v32 = vpop.f32.mrb[16].mxu1 }
  0xfa   :  { %838 = vst.msk [vmem:[#allocation2 + $0x40] sm:$0xff] %vm22_vm1, %v774_v47  ;;  %870 = vst.msk [vmem:[#allocation2 + $0x140] sm:$0xff] %vm22_vm1, %v806_v52  ;;  %v781_v24 = vadd.f32 %v1736_v56, %v102_v12  ;;  %v813_v5 = vadd.f32 %v1768_v3, %v134_v14  ;;  %v779_v26 = vadd.f32 %v562_v6, %v100_v18  ;;  %v575_v33 = vpop.f32.mrb[17].mxu0  ;;  %v703_v38 = vpop.f32.mrb[17].mxu1 }
  0xfb   :  { %1461 = vst.msk [vmem:[%s2685_s4 + $0x94] sm:$0xf] %vm1423_vm2, %v1659_v16  ;;  %v811_v27 = vadd.f32 %v690_v15, %v132_v19  ;;  %v784_v31 = vadd.f32 %v1739_v28, %v105_v21  ;;  %v816_v36 = vadd.f32 %v1771_v32, %v137_v25  ;;  %v782_v37 = vadd.f32 %v575_v33, %v103_v13  ;;  %v1740_v39 = vpop.f32.mrb[18].mxu0  ;;  %v1772_v43 = vpop.f32.mrb[18].mxu1 }
  0xfc   :  { %841 = vst.msk [vmem:[#allocation2 + $0x58] sm:$0xff] %vm22_vm1, %v777_v53  ;;  %873 = vst.msk [vmem:[#allocation2 + $0x158] sm:$0xff] %vm22_vm1, %v809_v17  ;;  %v814_v41 = vadd.f32 %v703_v38, %v135_v29  ;;  %v785_v42 = vadd.f32 %v1740_v39, %v106_v30  ;;  %v578_v44 = vpop.f32.mrb[19].mxu0  ;;  %v817_v46 = vadd.f32 %v1772_v43, %v138_v34  ;;  %v706_v49 = vpop.f32.mrb[19].mxu1 }
  0xfd   :  { %839 = vst.msk [vmem:[#allocation2 + $0x48] sm:$0xff] %vm22_vm1, %v775_v59  ;;  %871 = vst.msk [vmem:[#allocation2 + $0x148] sm:$0xff] %vm22_vm1, %v807_v60  ;;  %v783_v48 = vadd.f32 %v578_v44, %v104_v35  ;;  %v815_v55 = vadd.f32 %v706_v49, %v136_v40 }
  0xfe   :  { %844 = vst.msk [vmem:[#allocation2 + $0x70] sm:$0xff] %vm22_vm1, %v780_v4  ;;  %876 = vst.msk [vmem:[#allocation2 + $0x170] sm:$0xff] %vm22_vm1, %v812_v20 }
  0xff   :  { %842 = vst.msk [vmem:[#allocation2 + $0x60] sm:$0xff] %vm22_vm1, %v778_v22  ;;  %874 = vst.msk [vmem:[#allocation2 + $0x160] sm:$0xff] %vm22_vm1, %v810_v23  ;;  %v907_v45 = vld [vmem:[#allocation2 + $0x50] sm:$0xff] }
 0x100   :  { %845 = vst.msk [vmem:[#allocation2 + $0x78] sm:$0xff] %vm22_vm1, %v781_v24  ;;  %877 = vst.msk [vmem:[#allocation2 + $0x178] sm:$0xff] %vm22_vm1, %v813_v5  ;;  %v978_v50 = vmul.f32 %v2128_v62, %v907_v45  ;;  %v939_v51 = vld [vmem:[#allocation2 + $0x150] sm:$0xff] }
 0x101   :  { %843 = vst.msk [vmem:[#allocation2 + $0x68] sm:$0xff] %vm22_vm1, %v779_v26  ;;  %875 = vst.msk [vmem:[#allocation2 + $0x168] sm:$0xff] %vm22_vm1, %v811_v27  ;;  %v905_v54 = vld [vmem:[#allocation2 + $0x40] sm:$0xff]  ;;  %v1010_v56 = vmul.f32 %v2128_v62, %v939_v51  ;;  %v2298_v12 = vpop.f32.mrb[20].mxu0  ;;  %v2303_v53 = vpop.f32.mrb[20].mxu1 }
 0x102   :  { %848 = vst.msk [vmem:[#allocation2 + $0x90] sm:$0xff] %vm22_vm1, %v784_v31  ;;  %880 = vst.msk [vmem:[#allocation2 + $0x190] sm:$0xff] %vm22_vm1, %v816_v36  ;;  %v976_v57 = vmul.f32 %v2128_v62, %v905_v54  ;;  %v937_v58 = vld [vmem:[#allocation2 + $0x140] sm:$0xff]  ;;  %v1049_v0 = vadd.f32 %v2133_v8, %v978_v50  ;;  %v2305_v17 = vpop.f32.mrb[21].mxu0  ;;  %v2309_v21 = vpop.f32.mrb[21].mxu1 }
 0x103   :  { %846 = vst.msk [vmem:[#allocation2 + $0x80] sm:$0xff] %vm22_vm1, %v782_v37  ;;  %878 = vst.msk [vmem:[#allocation2 + $0x180] sm:$0xff] %vm22_vm1, %v814_v41  ;;  %v908_v61 = vld [vmem:[#allocation2 + $0x58] sm:$0xff]  ;;  %v1008_v1 = vmul.f32 %v2128_v62, %v937_v58  ;;  %v1081_v9 = vadd.f32 %v2133_v8, %v1010_v56  ;;  %v2311_v22 = vpop.f32.mrb[22].mxu0  ;;  %v2313_v27 = vpop.f32.mrb[22].mxu1 }
 0x104   :  { %849 = vst.msk [vmem:[#allocation2 + $0x98] sm:$0xff] %vm22_vm1, %v785_v42  ;;  %v940_v63 = vld [vmem:[#allocation2 + $0x158] sm:$0xff]  ;;  %881 = vst.msk [vmem:[#allocation2 + $0x198] sm:$0xff] %vm22_vm1, %v817_v46  ;;  %v979_v2 = vmul.f32 %v2128_v62, %v908_v61  ;;  %v906_v6 = vld [vmem:[#allocation2 + $0x48] sm:$0xff]  ;;  %v1047_v10 = vadd.f32 %v2133_v8, %v976_v57  ;;  %v1113_v14 = vmax.f32 %v1049_v0, 0.0  ;;  %v2315_v34 = vpop.f32.mrb[23].mxu0 }
 0x105   :  { %847 = vst.msk [vmem:[#allocation2 + $0x88] sm:$0xff] %vm22_vm1, %v783_v48  ;;  %v1011_v3 = vmul.f32 %v2128_v62, %v940_v63  ;;  %v938_v7 = vld [vmem:[#allocation2 + $0x148] sm:$0xff]  ;;  %879 = vst.msk [vmem:[#allocation2 + $0x188] sm:$0xff] %vm22_vm1, %v815_v55  ;;  %v977_v47 = vmul.f32 %v2128_v62, %v906_v6  ;;  %v1079_v15 = vadd.f32 %v2133_v8, %v1008_v1  ;;  %v1145_v18 = vmax.f32 %v1081_v9, 0.0  ;;  %v911_v4 = vld [vmem:[#allocation2 + $0x70] sm:$0xff]  ;;  %v2317_v35 = vpop.f32.mrb[23].mxu1 }
 0x106   :  { %v1009_v11 = vmul.f32 %v2128_v62, %v938_v7  ;;  %v1050_v16 = vadd.f32 %v2133_v8, %v979_v2  ;;  %v1111_v19 = vmax.f32 %v1047_v10, 0.0  ;;  %v943_v20 = vld [vmem:[#allocation2 + $0x170] sm:$0xff]  ;;  %v1632_v23 = vpack.c.bf16 %v1113_v14, %v1113_v14  ;;  %v909_v13 = vld [vmem:[#allocation2 + $0x60] sm:$0xff] }
 0x107   :  { %v1082_v52 = vadd.f32 %v2133_v8, %v1011_v3  ;;  %v1048_v59 = vadd.f32 %v2133_v8, %v977_v47  ;;  %v1143_v24 = vmax.f32 %v1079_v15, 0.0  ;;  %v941_v26 = vld [vmem:[#allocation2 + $0x160] sm:$0xff]  ;;  %v1664_v28 = vpack.c.bf16 %v1145_v18, %v1145_v18  ;;  %v912_v32 = vld [vmem:[#allocation2 + $0x78] sm:$0xff] }
 0x108   :  { %v1080_v60 = vadd.f32 %v2133_v8, %v1009_v11  ;;  %v1114_v5 = vmax.f32 %v1050_v16, 0.0  ;;  %v1630_v29 = vpack.c.bf16 %v1111_v19, %v1111_v19  ;;  %v944_v33 = vld [vmem:[#allocation2 + $0x178] sm:$0xff]  ;;  %1434 = vst.msk [vmem:[%s2685_s4 + $0x28] sm:$0xf] %vm1423_vm2, %v1632_v23  ;;  %v982_v39 = vmul.f32 %v2128_v62, %v911_v4  ;;  %v910_v40 = vld [vmem:[#allocation2 + $0x68] sm:$0xff] }
 0x109   :  { %v1146_v25 = vmax.f32 %v1082_v52, 0.0  ;;  %v1112_v30 = vmax.f32 %v1048_v59, 0.0  ;;  %v1662_v36 = vpack.c.bf16 %v1143_v24, %v1143_v24  ;;  %v942_v41 = vld [vmem:[#allocation2 + $0x168] sm:$0xff]  ;;  %1466 = vst.msk [vmem:[%s2685_s4 + $0xa8] sm:$0xf] %vm1423_vm2, %v1664_v28  ;;  %v1014_v44 = vmul.f32 %v2128_v62, %v943_v20  ;;  %v2362_v57 = vpop.f32.mrb[24].mxu0 }
 0x10a   :  { %v1144_v31 = vmax.f32 %v1080_v60, 0.0  ;;  %v1633_v37 = vpack.c.bf16 %v1114_v5, %v1114_v5  ;;  %1432 = vst.msk [vmem:[%s2685_s4 + $0x20] sm:$0xf] %vm1423_vm2, %v1630_v29  ;;  %v980_v45 = vmul.f32 %v2128_v62, %v909_v13  ;;  %v1053_v46 = vadd.f32 %v2133_v8, %v982_v39  ;;  %v2367_v1 = vpop.f32.mrb[24].mxu1  ;;  %v2369_v2 = vpop.f32.mrb[25].mxu0  ;;  %v915_v10 = vld [vmem:[#allocation2 + $0x90] sm:$0xff] }
 0x10b   :  { %v1665_v38 = vpack.c.bf16 %v1146_v25, %v1146_v25  ;;  %v1631_v42 = vpack.c.bf16 %v1112_v30, %v1112_v30  ;;  %1464 = vst.msk [vmem:[%s2685_s4 + $0xa0] sm:$0xf] %vm1423_vm2, %v1662_v36  ;;  %v1012_v48 = vmul.f32 %v2128_v62, %v941_v26  ;;  %v983_v49 = vmul.f32 %v2128_v62, %v912_v32  ;;  %v947_v47 = vld [vmem:[#allocation2 + $0x190] sm:$0xff]  ;;  %v2373_v11 = vpop.f32.mrb[25].mxu1  ;;  %v2375_v14 = vpop.f32.mrb[26].mxu0  ;;  %v913_v19 = vld [vmem:[#allocation2 + $0x80] sm:$0xff] }
 0x10c   :  { %v1663_v43 = vpack.c.bf16 %v1144_v31, %v1144_v31  ;;  %1435 = vst.msk [vmem:[%s2685_s4 + $0x2c] sm:$0xf] %vm1423_vm2, %v1633_v37  ;;  %v1015_v50 = vmul.f32 %v2128_v62, %v944_v33  ;;  %v1085_v51 = vadd.f32 %v2133_v8, %v1014_v44  ;;  %v1051_v54 = vadd.f32 %v2133_v8, %v980_v45  ;;  %v2377_v59 = vpop.f32.mrb[26].mxu1  ;;  %v2379_v60 = vpop.f32.mrb[27].mxu0  ;;  %v945_v5 = vld [vmem:[#allocation2 + $0x180] sm:$0xff]  ;;  %v916_v25 = vld [vmem:[#allocation2 + $0x98] sm:$0xff] }
 0x10d   :  { %1467 = vst.msk [vmem:[%s2685_s4 + $0xac] sm:$0xf] %vm1423_vm2, %v1665_v38  ;;  %1433 = vst.msk [vmem:[%s2685_s4 + $0x24] sm:$0xf] %vm1423_vm2, %v1631_v42  ;;  %v981_v55 = vmul.f32 %v2128_v62, %v910_v40  ;;  %v1013_v56 = vmul.f32 %v2128_v62, %v942_v41  ;;  %v1117_v58 = vmax.f32 %v1053_v46, 0.0  ;;  %v1083_v61 = vadd.f32 %v2133_v8, %v1012_v48  ;;  %v948_v13 = vld [vmem:[#allocation2 + $0x198] sm:$0xff] }
 0x10e   :  { %1465 = vst.msk [vmem:[%s2685_s4 + $0xa4] sm:$0xf] %vm1423_vm2, %v1663_v43  ;;  %v1054_v63 = vadd.f32 %v2133_v8, %v983_v49  ;;  %v1086_v0 = vadd.f32 %v2133_v8, %v1015_v50  ;;  %v1149_v3 = vmax.f32 %v1085_v51, 0.0  ;;  %v1115_v6 = vmax.f32 %v1051_v54, 0.0  ;;  %v2381_v26 = vpop.f32.mrb[27].mxu1  ;;  %v914_v32 = vld [vmem:[#allocation2 + $0x88] sm:$0xff] }
 0x10f   :  { %v1052_v7 = vadd.f32 %v2133_v8, %v981_v55  ;;  %v1084_v9 = vadd.f32 %v2133_v8, %v1013_v56  ;;  %v1636_v15 = vpack.c.bf16 %v1117_v58, %v1117_v58  ;;  %v1147_v16 = vmax.f32 %v1083_v61, 0.0  ;;  %v946_v33 = vld [vmem:[#allocation2 + $0x188] sm:$0xff]  ;;  %v109_v56 = vld [vmem:[#allocation2 + $0xb0] sm:$0xff]  ;;  %v107_v61 = vld [vmem:[#allocation2 + $0xa0] sm:$0xff] }
 0x110   :  { %v1118_v52 = vmax.f32 %v1054_v63, 0.0  ;;  %v1150_v18 = vmax.f32 %v1086_v0, 0.0  ;;  %v1668_v4 = vpack.c.bf16 %v1149_v3, %v1149_v3  ;;  %v1634_v20 = vpack.c.bf16 %v1115_v6, %v1115_v6  ;;  %v141_v58 = vld [vmem:[#allocation2 + $0x1b0] sm:$0xff] }
 0x111   :  { %v1116_v23 = vmax.f32 %v1052_v7, 0.0  ;;  %v1148_v24 = vmax.f32 %v1084_v9, 0.0  ;;  %1438 = vst.msk [vmem:[%s2685_s4 + $0x38] sm:$0xf] %vm1423_vm2, %v1636_v15  ;;  %v1666_v28 = vpack.c.bf16 %v1147_v16, %v1147_v16  ;;  %v986_v31 = vmul.f32 %v2128_v62, %v915_v10  ;;  %v2426_v49 = vpop.f32.mrb[28].mxu0  ;;  %v2431_v63 = vpop.f32.mrb[28].mxu1 }
 0x112   :  { %v1637_v29 = vpack.c.bf16 %v1118_v52, %v1118_v52  ;;  %v1669_v30 = vpack.c.bf16 %v1150_v18, %v1150_v18  ;;  %1470 = vst.msk [vmem:[%s2685_s4 + $0xb8] sm:$0xf] %vm1423_vm2, %v1668_v4  ;;  %1436 = vst.msk [vmem:[%s2685_s4 + $0x30] sm:$0xf] %vm1423_vm2, %v1634_v20  ;;  %v1018_v38 = vmul.f32 %v2128_v62, %v947_v47  ;;  %v2433_v0 = vpop.f32.mrb[29].mxu0  ;;  %v139_v10 = vld [vmem:[#allocation2 + $0x1a0] sm:$0xff] }
 0x113   :  { %v1635_v36 = vpack.c.bf16 %v1116_v23, %v1116_v23  ;;  %v1667_v37 = vpack.c.bf16 %v1148_v24, %v1148_v24  ;;  %v984_v39 = vmul.f32 %v2128_v62, %v913_v19  ;;  %1468 = vst.msk [vmem:[%s2685_s4 + $0xb0] sm:$0xf] %vm1423_vm2, %v1666_v28  ;;  %v1057_v40 = vadd.f32 %v2133_v8, %v986_v31  ;;  %v110_v47 = vld [vmem:[#allocation2 + $0xb8] sm:$0xff]  ;;  %v108_v16 = vld [vmem:[#allocation2 + $0xa8] sm:$0xff]  ;;  %v2437_v52 = vpop.f32.mrb[29].mxu1  ;;  %v2439_v18 = vpop.f32.mrb[30].mxu0 }
 0x114   :  { %1439 = vst.msk [vmem:[%s2685_s4 + $0x3c] sm:$0xf] %vm1423_vm2, %v1637_v29  ;;  %1471 = vst.msk [vmem:[%s2685_s4 + $0xbc] sm:$0xf] %vm1423_vm2, %v1669_v30  ;;  %v1016_v41 = vmul.f32 %v2128_v62, %v945_v5  ;;  %v987_v42 = vmul.f32 %v2128_v62, %v916_v25  ;;  %v1019_v43 = vmul.f32 %v2128_v62, %v948_v13  ;;  %v142_v15 = vld [vmem:[#allocation2 + $0x1b8] sm:$0xff]  ;;  %v140_v24 = vld [vmem:[#allocation2 + $0x1a8] sm:$0xff] }
 0x115   :  { %1437 = vst.msk [vmem:[%s2685_s4 + $0x34] sm:$0xf] %vm1423_vm2, %v1635_v36  ;;  %1469 = vst.msk [vmem:[%s2685_s4 + $0xb4] sm:$0xf] %vm1423_vm2, %v1667_v37  ;;  %v1089_v44 = vadd.f32 %v2133_v8, %v1018_v38  ;;  %v1055_v45 = vadd.f32 %v2133_v8, %v984_v39  ;;  %v985_v46 = vmul.f32 %v2128_v62, %v914_v32  ;;  %v1121_v50 = vmax.f32 %v1057_v40, 0.0  ;;  %v2441_v5 = vpop.f32.mrb[30].mxu1 }
 0x116   :  { %v1017_v48 = vmul.f32 %v2128_v62, %v946_v33  ;;  %v1087_v51 = vadd.f32 %v2133_v8, %v1016_v41  ;;  %v1058_v54 = vadd.f32 %v2133_v8, %v987_v42  ;;  %v1090_v55 = vadd.f32 %v2133_v8, %v1019_v43  ;;  %v2443_v25 = vpop.f32.mrb[31].mxu0  ;;  %v113_v31 = vld [vmem:[#allocation2 + $0xd0] sm:$0xff]  ;;  %v111_v33 = vld [vmem:[#allocation2 + $0xc0] sm:$0xff]  ;;  %v2445_v36 = vpop.f32.mrb[31].mxu1  ;;  %v114_v42 = vld [vmem:[#allocation2 + $0xd8] sm:$0xff] }
 0x117   :  { %v1153_v3 = vmax.f32 %v1089_v44, 0.0  ;;  %v1119_v6 = vmax.f32 %v1055_v45, 0.0  ;;  %v1056_v7 = vadd.f32 %v2133_v8, %v985_v46  ;;  %v1640_v19 = vpack.c.bf16 %v1121_v50, %v1121_v50  ;;  %v145_v32 = vld [vmem:[#allocation2 + $0x1d0] sm:$0xff]  ;;  %v143_v41 = vld [vmem:[#allocation2 + $0x1c0] sm:$0xff]  ;;  %v146_v43 = vld [vmem:[#allocation2 + $0x1d8] sm:$0xff] }
 0x118   :  { %v1088_v9 = vadd.f32 %v2133_v8, %v1017_v48  ;;  %v1151_v4 = vmax.f32 %v1087_v51, 0.0  ;;  %v1122_v20 = vmax.f32 %v1058_v54, 0.0  ;;  %v1154_v23 = vmax.f32 %v1090_v55, 0.0  ;;  %v144_v50 = vld [vmem:[#allocation2 + $0x1c8] sm:$0xff]  ;;  %v117_v51 = vld [vmem:[#allocation2 + $0xf0] sm:$0xff] }
 0x119   :  { %v1672_v13 = vpack.c.bf16 %v1153_v3, %v1153_v3  ;;  %v1638_v28 = vpack.c.bf16 %v1119_v6, %v1119_v6  ;;  %v1120_v29 = vmax.f32 %v1056_v7, 0.0  ;;  %1442 = vst.msk [vmem:[%s2685_s4 + $0x48] sm:$0xf] %vm1423_vm2, %v1640_v19  ;;  %v788_v40 = vadd.f32 %v2298_v12, %v109_v56  ;;  %v112_v12 = vld [vmem:[#allocation2 + $0xc8] sm:$0xff]  ;;  %v149_v56 = vld [vmem:[#allocation2 + $0x1f0] sm:$0xff]  ;;  %v118_v3 = vld [vmem:[#allocation2 + $0xf8] sm:$0xff] }
 0x11a   :  { %v1152_v30 = vmax.f32 %v1088_v9, 0.0  ;;  %v1670_v37 = vpack.c.bf16 %v1151_v4, %v1151_v4  ;;  %v1641_v38 = vpack.c.bf16 %v1122_v20, %v1122_v20  ;;  %v1673_v39 = vpack.c.bf16 %v1154_v23, %v1154_v23  ;;  %v150_v6 = vld [vmem:[#allocation2 + $0x1f8] sm:$0xff]  ;;  %v116_v7 = vld [vmem:[#allocation2 + $0xe8] sm:$0xff] }
 0x11b   :  { %1474 = vst.msk [vmem:[%s2685_s4 + $0xc8] sm:$0xf] %vm1423_vm2, %v1672_v13  ;;  %1440 = vst.msk [vmem:[%s2685_s4 + $0x40] sm:$0xf] %vm1423_vm2, %v1638_v28  ;;  %v1639_v44 = vpack.c.bf16 %v1120_v29, %v1120_v29  ;;  %v820_v46 = vadd.f32 %v2303_v53, %v141_v58  ;;  %v786_v48 = vadd.f32 %v2305_v17, %v107_v61  ;;  %v115_v58 = vld [vmem:[#allocation2 + $0xe0] sm:$0xff] }
 0x11c   :  { %v1671_v45 = vpack.c.bf16 %v1152_v30, %v1152_v30  ;;  %1472 = vst.msk [vmem:[%s2685_s4 + $0xc0] sm:$0xf] %vm1423_vm2, %v1670_v37  ;;  %1443 = vst.msk [vmem:[%s2685_s4 + $0x4c] sm:$0xf] %vm1423_vm2, %v1641_v38  ;;  %v818_v53 = vadd.f32 %v2309_v21, %v139_v10  ;;  %v789_v17 = vadd.f32 %v2311_v22, %v110_v47  ;;  %v147_v61 = vld [vmem:[#allocation2 + $0x1e0] sm:$0xff] }
 0x11d   :  { %1475 = vst.msk [vmem:[%s2685_s4 + $0xcc] sm:$0xf] %vm1423_vm2, %v1673_v39  ;;  %v821_v54 = vadd.f32 %v2313_v27, %v142_v15  ;;  %v787_v55 = vadd.f32 %v2315_v34, %v108_v16  ;;  %1441 = vst.msk [vmem:[%s2685_s4 + $0x44] sm:$0xf] %vm1423_vm2, %v1639_v44  ;;  %v819_v21 = vadd.f32 %v2317_v35, %v140_v24 }
 0x11e   :  { %852 = vst.msk [vmem:[#allocation2 + $0xb0] sm:$0xff] %vm22_vm1, %v788_v40  ;;  %884 = vst.msk [vmem:[#allocation2 + $0x1b0] sm:$0xff] %vm22_vm1, %v820_v46  ;;  %v792_v22 = vadd.f32 %v2362_v57, %v113_v31  ;;  %v824_v27 = vadd.f32 %v2367_v1, %v145_v32  ;;  %v790_v34 = vadd.f32 %v2369_v2, %v111_v33  ;;  %v148_v2 = vld [vmem:[#allocation2 + $0x1e8] sm:$0xff] }
 0x11f   :  { %1473 = vst.msk [vmem:[%s2685_s4 + $0xc4] sm:$0xf] %vm1423_vm2, %v1671_v45  ;;  %v822_v9 = vadd.f32 %v2373_v11, %v143_v41  ;;  %v793_v35 = vadd.f32 %v2375_v14, %v114_v42  ;;  %v825_v57 = vadd.f32 %v2377_v59, %v146_v43  ;;  %v791_v1 = vadd.f32 %v2379_v60, %v112_v12 }
 0x120   :  { %850 = vst.msk [vmem:[#allocation2 + $0xa0] sm:$0xff] %vm22_vm1, %v786_v48  ;;  %882 = vst.msk [vmem:[#allocation2 + $0x1a0] sm:$0xff] %vm22_vm1, %v818_v53  ;;  %v823_v10 = vadd.f32 %v2381_v26, %v144_v50  ;;  %v796_v47 = vadd.f32 %v2426_v49, %v117_v51  ;;  %v828_v11 = vadd.f32 %v2431_v63, %v149_v56 }
 0x121   :  { %853 = vst.msk [vmem:[#allocation2 + $0xb8] sm:$0xff] %vm22_vm1, %v789_v17  ;;  %885 = vst.msk [vmem:[#allocation2 + $0x1b8] sm:$0xff] %vm22_vm1, %v821_v54  ;;  %v794_v14 = vadd.f32 %v2433_v0, %v115_v58  ;;  %v826_v59 = vadd.f32 %v2437_v52, %v147_v61  ;;  %v797_v60 = vadd.f32 %v2439_v18, %v118_v3 }
 0x122   :  { %851 = vst.msk [vmem:[#allocation2 + $0xa8] sm:$0xff] %vm22_vm1, %v787_v55  ;;  %883 = vst.msk [vmem:[#allocation2 + $0x1a8] sm:$0xff] %vm22_vm1, %v819_v21  ;;  %v829_v26 = vadd.f32 %v2441_v5, %v150_v6  ;;  %v795_v49 = vadd.f32 %v2443_v25, %v116_v7  ;;  %v827_v63 = vadd.f32 %v2445_v36, %v148_v2 }
 0x123   :  { %856 = vst.msk [vmem:[#allocation2 + $0xd0] sm:$0xff] %vm22_vm1, %v792_v22  ;;  %888 = vst.msk [vmem:[#allocation2 + $0x1d0] sm:$0xff] %vm22_vm1, %v824_v27 }
 0x124   :  { %854 = vst.msk [vmem:[#allocation2 + $0xc0] sm:$0xff] %vm22_vm1, %v790_v34  ;;  %886 = vst.msk [vmem:[#allocation2 + $0x1c0] sm:$0xff] %vm22_vm1, %v822_v9  ;;  %v2559_v9 = vld [vmem:[%s2683_s2] ss:$0 sm:$0xff] }
 0x125   :  { %857 = vst.msk [vmem:[#allocation2 + $0xd8] sm:$0xff] %vm22_vm1, %v793_v35  ;;  %889 = vst.msk [vmem:[#allocation2 + $0x1d8] sm:$0xff] %vm22_vm1, %v825_v57  ;;  %v919_v0 = vld [vmem:[#allocation2 + $0xb0] sm:$0xff]  ;;  %v2578_v57 = vld [vmem:[%s2684_s3] ss:$0 sm:$0xff] }
 0x126   :  { %855 = vst.msk [vmem:[#allocation2 + $0xc8] sm:$0xff] %vm22_vm1, %v791_v1  ;;  %887 = vst.msk [vmem:[#allocation2 + $0x1c8] sm:$0xff] %vm22_vm1, %v823_v10  ;;  %v990_v15 = vmul.f32 %v2128_v62, %v919_v0  ;;  %v951_v16 = vld [vmem:[#allocation2 + $0x1b0] sm:$0xff] }
 0x127   :  { %860 = vst.msk [vmem:[#allocation2 + $0xf0] sm:$0xff] %vm22_vm1, %v796_v47  ;;  %892 = vst.msk [vmem:[#allocation2 + $0x1f0] sm:$0xff] %vm22_vm1, %v828_v11  ;;  %v917_v52 = vld [vmem:[#allocation2 + $0xa0] sm:$0xff]  ;;  %v1022_v18 = vmul.f32 %v2128_v62, %v951_v16 }
 0x128   :  { %858 = vst.msk [vmem:[#allocation2 + $0xe0] sm:$0xff] %vm22_vm1, %v794_v14  ;;  %890 = vst.msk [vmem:[#allocation2 + $0x1e0] sm:$0xff] %vm22_vm1, %v826_v59  ;;  %v988_v19 = vmul.f32 %v2128_v62, %v917_v52  ;;  %v949_v4 = vld [vmem:[#allocation2 + $0x1a0] sm:$0xff]  ;;  %v920_v20 = vld [vmem:[#allocation2 + $0xb8] sm:$0xff]  ;;  %v1061_v24 = vadd.f32 %v2133_v8, %v990_v15 }
 0x129   :  { %861 = vst.msk [vmem:[#allocation2 + $0xf8] sm:$0xff] %vm22_vm1, %v797_v60  ;;  %893 = vst.msk [vmem:[#allocation2 + $0x1f8] sm:$0xff] %vm22_vm1, %v829_v26  ;;  %v952_v23 = vld [vmem:[#allocation2 + $0x1b8] sm:$0xff]  ;;  %v1020_v5 = vmul.f32 %v2128_v62, %v949_v4  ;;  %v991_v25 = vmul.f32 %v2128_v62, %v920_v20  ;;  %v918_v28 = vld [vmem:[#allocation2 + $0xa8] sm:$0xff]  ;;  %v1093_v30 = vadd.f32 %v2133_v8, %v1022_v18 }
 0x12a   :  { %859 = vst.msk [vmem:[#allocation2 + $0xe8] sm:$0xff] %vm22_vm1, %v795_v49  ;;  %891 = vst.msk [vmem:[#allocation2 + $0x1e8] sm:$0xff] %vm22_vm1, %v827_v63  ;;  %v1023_v13 = vmul.f32 %v2128_v62, %v952_v23  ;;  %v950_v29 = vld [vmem:[#allocation2 + $0x1a8] sm:$0xff]  ;;  %v1059_v31 = vadd.f32 %v2133_v8, %v988_v19  ;;  %v989_v32 = vmul.f32 %v2128_v62, %v918_v28  ;;  %v1125_v36 = vmax.f32 %v1061_v24, 0.0  ;;  %v923_v44 = vld [vmem:[#allocation2 + $0xd0] sm:$0xff] }
 0x12b   :  { %v1021_v33 = vmul.f32 %v2128_v62, %v950_v29  ;;  %v1091_v37 = vadd.f32 %v2133_v8, %v1020_v5  ;;  %v1062_v38 = vadd.f32 %v2133_v8, %v991_v25  ;;  %v1157_v40 = vmax.f32 %v1093_v30, 0.0  ;;  %v955_v50 = vld [vmem:[#allocation2 + $0x1d0] sm:$0xff]  ;;  %v921_v51 = vld [vmem:[#allocation2 + $0xc0] sm:$0xff] }
 0x12c   :  { %v1094_v39 = vadd.f32 %v2133_v8, %v1023_v13  ;;  %v1123_v41 = vmax.f32 %v1059_v31, 0.0  ;;  %v1060_v42 = vadd.f32 %v2133_v8, %v989_v32  ;;  %v1644_v45 = vpack.c.bf16 %v1125_v36, %v1125_v36  ;;  %v953_v56 = vld [vmem:[#allocation2 + $0x1c0] sm:$0xff]  ;;  %v924_v58 = vld [vmem:[#allocation2 + $0xd8] sm:$0xff] }
 0x12d   :  { %v1092_v43 = vadd.f32 %v2133_v8, %v1021_v33  ;;  %v1155_v46 = vmax.f32 %v1091_v37, 0.0  ;;  %v1126_v48 = vmax.f32 %v1062_v38, 0.0  ;;  %v1676_v53 = vpack.c.bf16 %v1157_v40, %v1157_v40  ;;  %v956_v61 = vld [vmem:[#allocation2 + $0x1d8] sm:$0xff]  ;;  %v922_v34 = vld [vmem:[#allocation2 + $0xc8] sm:$0xff] }
 0x12e   :  { %v1158_v12 = vmax.f32 %v1094_v39, 0.0  ;;  %v1642_v17 = vpack.c.bf16 %v1123_v41, %v1123_v41  ;;  %v1124_v54 = vmax.f32 %v1060_v42, 0.0  ;;  %1446 = vst.msk [vmem:[%s2685_s4 + $0x58] sm:$0xf] %vm1423_vm2, %v1644_v45  ;;  %v994_v27 = vmul.f32 %v2128_v62, %v923_v44  ;;  %v954_v3 = vld [vmem:[#allocation2 + $0x1c8] sm:$0xff]  ;;  %v927_v19 = vld [vmem:[#allocation2 + $0xf0] sm:$0xff] }
 0x12f   :  { %v1156_v55 = vmax.f32 %v1092_v43, 0.0  ;;  %v1674_v8 = vpack.c.bf16 %v1155_v46, %v1155_v46  ;;  %v1645_v21 = vpack.c.bf16 %v1126_v48, %v1126_v48  ;;  %1478 = vst.msk [vmem:[%s2685_s4 + $0xd8] sm:$0xf] %vm1423_vm2, %v1676_v53  ;;  %v1026_v62 = vmul.f32 %v2559_v9, %v955_v50  ;;  %v959_v5 = vld [vmem:[#allocation2 + $0x1f0] sm:$0xff]  ;;  %v925_v25 = vld [vmem:[#allocation2 + $0xe0] sm:$0xff] }
 0x130   :  { %v1677_v22 = vpack.c.bf16 %v1158_v12, %v1158_v12  ;;  %1444 = vst.msk [vmem:[%s2685_s4 + $0x50] sm:$0xf] %vm1423_vm2, %v1642_v17  ;;  %v1643_v6 = vpack.c.bf16 %v1124_v54, %v1124_v54  ;;  %v992_v35 = vmul.f32 %v2559_v9, %v921_v51  ;;  %v1065_v1 = vadd.f32 %v2578_v57, %v994_v27  ;;  %v957_v31 = vld [vmem:[#allocation2 + $0x1e0] sm:$0xff]  ;;  %v928_v32 = vld [vmem:[#allocation2 + $0xf8] sm:$0xff] }
 0x131   :  { %v1675_v7 = vpack.c.bf16 %v1156_v55, %v1156_v55  ;;  %1476 = vst.msk [vmem:[%s2685_s4 + $0xd0] sm:$0xf] %vm1423_vm2, %v1674_v8  ;;  %1447 = vst.msk [vmem:[%s2685_s4 + $0x5c] sm:$0xf] %vm1423_vm2, %v1645_v21  ;;  %v1024_v2 = vmul.f32 %v2559_v9, %v953_v56  ;;  %v995_v10 = vmul.f32 %v2559_v9, %v924_v58  ;;  %v960_v33 = vld [vmem:[#allocation2 + $0x1f8] sm:$0xff]  ;;  %v926_v40 = vld [vmem:[#allocation2 + $0xe8] sm:$0xff] }
 0x132   :  { %1479 = vst.msk [vmem:[%s2685_s4 + $0xdc] sm:$0xf] %vm1423_vm2, %v1677_v22  ;;  %v1027_v47 = vmul.f32 %v2559_v9, %v956_v61  ;;  %1445 = vst.msk [vmem:[%s2685_s4 + $0x54] sm:$0xf] %vm1423_vm2, %v1643_v6  ;;  %v1097_v11 = vadd.f32 %v2578_v57, %v1026_v62  ;;  %v1063_v14 = vadd.f32 %v2578_v57, %v992_v35  ;;  %v1129_v26 = vmax.f32 %v1065_v1, 0.0  ;;  %v958_v41 = vld [vmem:[#allocation2 + $0x1e8] sm:$0xff] }
 0x133   :  { %1477 = vst.msk [vmem:[%s2685_s4 + $0xd4] sm:$0xf] %vm1423_vm2, %v1675_v7  ;;  %v993_v59 = vmul.f32 %v2559_v9, %v922_v34  ;;  %v1025_v60 = vmul.f32 %v2559_v9, %v954_v3  ;;  %v1095_v49 = vadd.f32 %v2578_v57, %v1024_v2  ;;  %v1066_v63 = vadd.f32 %v2578_v57, %v995_v10 }
 0x134   :  { %v1098_v0 = vadd.f32 %v2578_v57, %v1027_v47  ;;  %v1161_v15 = vmax.f32 %v1097_v11, 0.0  ;;  %v1127_v16 = vmax.f32 %v1063_v14, 0.0  ;;  %v1648_v4 = vpack.c.bf16 %v1129_v26, %v1129_v26 }
 0x135   :  { %v1064_v52 = vadd.f32 %v2578_v57, %v993_v59  ;;  %v1096_v18 = vadd.f32 %v2578_v57, %v1025_v60  ;;  %v1159_v20 = vmax.f32 %v1095_v49, 0.0  ;;  %v1130_v23 = vmax.f32 %v1066_v63, 0.0 }
 0x136   :  { %v1162_v24 = vmax.f32 %v1098_v0, 0.0  ;;  %v1680_v13 = vpack.c.bf16 %v1161_v15, %v1161_v15  ;;  %v1646_v28 = vpack.c.bf16 %v1127_v16, %v1127_v16  ;;  %1450 = vst.msk [vmem:[%s2685_s4 + $0x68] sm:$0xf] %vm1423_vm2, %v1648_v4  ;;  %v998_v39 = vmul.f32 %v2559_v9, %v927_v19 }
 0x137   :  { %v1128_v29 = vmax.f32 %v1064_v52, 0.0  ;;  %v1160_v30 = vmax.f32 %v1096_v18, 0.0  ;;  %v1678_v36 = vpack.c.bf16 %v1159_v20, %v1159_v20  ;;  %v1649_v37 = vpack.c.bf16 %v1130_v23, %v1130_v23 }
 0x138   :  { %v1681_v38 = vpack.c.bf16 %v1162_v24, %v1162_v24  ;;  %1482 = vst.msk [vmem:[%s2685_s4 + $0xe8] sm:$0xf] %vm1423_vm2, %v1680_v13  ;;  %1448 = vst.msk [vmem:[%s2685_s4 + $0x60] sm:$0xf] %vm1423_vm2, %v1646_v28  ;;  %v1030_v44 = vmul.f32 %v2559_v9, %v959_v5  ;;  %v996_v45 = vmul.f32 %v2559_v9, %v925_v25 }
 0x139   :  { %v1647_v42 = vpack.c.bf16 %v1128_v29, %v1128_v29  ;;  %v1679_v43 = vpack.c.bf16 %v1160_v30, %v1160_v30  ;;  %1480 = vst.msk [vmem:[%s2685_s4 + $0xe0] sm:$0xf] %vm1423_vm2, %v1678_v36  ;;  %1451 = vst.msk [vmem:[%s2685_s4 + $0x6c] sm:$0xf] %vm1423_vm2, %v1649_v37  ;;  %v1069_v46 = vadd.f32 %v2578_v57, %v998_v39 }
 0x13a   :  { %1483 = vst.msk [vmem:[%s2685_s4 + $0xec] sm:$0xf] %vm1423_vm2, %v1681_v38  ;;  %v1028_v48 = vmul.f32 %v2559_v9, %v957_v31  ;;  %v999_v12 = vmul.f32 %v2559_v9, %v928_v32  ;;  %v1031_v50 = vmul.f32 %v2559_v9, %v960_v33  ;;  %v1101_v51 = vadd.f32 %v2578_v57, %v1030_v44 }
 0x13b   :  { %1449 = vst.msk [vmem:[%s2685_s4 + $0x64] sm:$0xf] %vm1423_vm2, %v1647_v42  ;;  %1481 = vst.msk [vmem:[%s2685_s4 + $0xe4] sm:$0xf] %vm1423_vm2, %v1679_v43  ;;  %v1067_v53 = vadd.f32 %v2578_v57, %v996_v45  ;;  %v997_v17 = vmul.f32 %v2559_v9, %v926_v40  ;;  %v1029_v54 = vmul.f32 %v2559_v9, %v958_v41  ;;  %v1133_v55 = vmax.f32 %v1069_v46, 0.0 }
 0x13c   :  { %v1099_v56 = vadd.f32 %v2578_v57, %v1028_v48  ;;  %v1070_v58 = vadd.f32 %v2578_v57, %v999_v12  ;;  %v1102_v61 = vadd.f32 %v2578_v57, %v1031_v50  ;;  %v1165_v8 = vmax.f32 %v1101_v51, 0.0 }
 0x13d   :  { %v1131_v21 = vmax.f32 %v1067_v53, 0.0  ;;  %v1068_v22 = vadd.f32 %v2578_v57, %v997_v17  ;;  %v1100_v27 = vadd.f32 %v2578_v57, %v1029_v54  ;;  %v1652_v34 = vpack.c.bf16 %v1133_v55, %v1133_v55 }
 0x13e   :  { %v1163_v3 = vmax.f32 %v1099_v56, 0.0  ;;  %v1134_v6 = vmax.f32 %v1070_v58, 0.0  ;;  %v1166_v7 = vmax.f32 %v1102_v61, 0.0  ;;  %v1684_v62 = vpack.c.bf16 %v1165_v8, %v1165_v8 }
 0x13f   :  { %v1650_v35 = vpack.c.bf16 %v1131_v21, %v1131_v21  ;;  %v1132_v9 = vmax.f32 %v1068_v22, 0.0  ;;  %v1164_v1 = vmax.f32 %v1100_v27, 0.0  ;;  %1454 = vst.msk [vmem:[%s2685_s4 + $0x78] sm:$0xf] %vm1423_vm2, %v1652_v34 }
 0x140   :  { %v1682_v2 = vpack.c.bf16 %v1163_v3, %v1163_v3  ;;  %v1653_v10 = vpack.c.bf16 %v1134_v6, %v1134_v6  ;;  %v1685_v47 = vpack.c.bf16 %v1166_v7, %v1166_v7  ;;  %1486 = vst.msk [vmem:[%s2685_s4 + $0xf8] sm:$0xf] %vm1423_vm2, %v1684_v62 }
 0x141   :  { %1452 = vst.msk [vmem:[%s2685_s4 + $0x70] sm:$0xf] %vm1423_vm2, %v1650_v35  ;;  %v1651_v57 = vpack.c.bf16 %v1132_v9, %v1132_v9  ;;  %v1683_v11 = vpack.c.bf16 %v1164_v1, %v1164_v1 }
 0x142   :  { %1484 = vst.msk [vmem:[%s2685_s4 + $0xf0] sm:$0xf] %vm1423_vm2, %v1682_v2  ;;  %1455 = vst.msk [vmem:[%s2685_s4 + $0x7c] sm:$0xf] %vm1423_vm2, %v1653_v10 }
 0x143   :  { %1487 = vst.msk [vmem:[%s2685_s4 + $0xfc] sm:$0xf] %vm1423_vm2, %v1685_v47  ;;  %1453 = vst.msk [vmem:[%s2685_s4 + $0x74] sm:$0xf] %vm1423_vm2, %v1651_v57 }
 0x144   :  { %1485 = vst.msk [vmem:[%s2685_s4 + $0xf4] sm:$0xf] %vm1423_vm2, %v1683_v11 }

</bundles_post_ra>
